<compile_context>
chip_gen: v5e
topology: v5e:2x2
jax: 0.10.0
libtpu: 0.0.40
codegen_flags: <defaults>
</compile_context>

<pallas_src>
import jax
import jax.numpy as jnp
from jax.experimental import pallas as pl
from jax.experimental.pallas import tpu as pltpu


def _mcr2_gram_kernel(x_ref, pi_ref, out_ref):
    """Grid: (sample split s ["parallel"], sample tile t ["arbitrary"]).

    Block shapes:
      x_ref   : (block_m, p_pad)      X tile, samples on sublanes, features on lanes
      pi_ref  : (block_m, G)          per-group sample weights for this tile
      out_ref : (G, p_pad, p_pad)     per-split partial Grams (resident across t)
    """
    t = pl.program_id(1)

    @pl.when(t == 0)
    def _():
        out_ref[...] = jnp.zeros_like(out_ref)

    x = x_ref[...]                    # (block_m, p_pad) f32
    pi = pi_ref[...]                  # (block_m, G)     f32
    # One shared transpose per tile (XLU, overlaps with MXU) so every group's
    # matmul is in canonical (p, K) @ (K, p) form -- no per-group transposes.
    xt = jnp.transpose(x)             # (p_pad, block_m)

    n_groups = out_ref.shape[0]
    for g in range(n_groups):         # unrolled; G is small and static
        xg = x * pi[:, g:g + 1]       # per-group sample weighting (lane broadcast)
        out_ref[g] = out_ref[g] + jnp.dot(
            xt, xg, preferred_element_type=jnp.float32)


def _group_grams(X, weights, *, block_m=None, num_splits=2):
    """gram[g] = X.T @ diag(weights[:, g]) @ X  for all groups g, shape (G, p, p)."""
    m, p = X.shape
    G = weights.shape[1]
    p_pad = 128 * pl.cdiv(p, 128)              # lane-dense output, full MXU width
    num_splits = max(1, int(num_splits))

    per_split = pl.cdiv(m, num_splits)
    if block_m is None:
        # ~4 MiB f32 X tiles: big enough to amortize the ~0.35 us/step overhead,
        # small enough that double-buffered tiles + transpose temp + (G,p,p)
        # accumulators fit v7x's 64 MiB VMEM (v5e/v6e have 128 MiB).
        block_m = (4 * 1024 * 1024) // (4 * p_pad)
    block_m = int(min(max(int(block_m), 128), 128 * pl.cdiv(per_split, 128)))
    block_m = 128 * pl.cdiv(block_m, 128)      # lane-aligned sample tiles
    tiles_per_split = pl.cdiv(per_split, block_m)
    m_pad = num_splits * tiles_per_split * block_m

    Xp = X.astype(jnp.float32)
    Wp = weights.astype(jnp.float32)
    if m_pad != m or p_pad != p:
        # Zero-valued padding samples / features contribute nothing to any Gram.
        Xp = jnp.pad(Xp, ((0, m_pad - m), (0, p_pad - p)))
    if m_pad != m:
        Wp = jnp.pad(Wp, ((0, m_pad - m), (0, 0)))

    flops = 2 * G * p_pad * p_pad * m_pad
    bytes_accessed = 4 * (m_pad * p_pad + m_pad * G + num_splits * G * p_pad * p_pad)

    partials = pl.pallas_call(
        _mcr2_gram_kernel,
        out_shape=jax.ShapeDtypeStruct((num_splits, G, p_pad, p_pad), jnp.float32),
        grid=(num_splits, tiles_per_split),
        in_specs=[
            pl.BlockSpec((block_m, p_pad),
                         lambda s, t: (s * tiles_per_split + t, 0)),
            pl.BlockSpec((block_m, G),
                         lambda s, t: (s * tiles_per_split + t, 0)),
        ],
        out_specs=pl.BlockSpec((None, G, p_pad, p_pad),
                               lambda s, t: (s, 0, 0, 0)),
        compiler_params=pltpu.CompilerParams(
            dimension_semantics=("parallel", "arbitrary"),
            vmem_limit_bytes=64 * 1024 * 1024),
        cost_estimate=pl.CostEstimate(
            flops=flops, transcendentals=0, bytes_accessed=bytes_accessed),
    )(Xp, Wp)

    gram = jnp.sum(partials, axis=0)           # combine per-core partials (tiny)
    return gram[:, :p, :p]


class MaximalCodingRateReduction:
    """JAX/Pallas port of the PyTorch MaximalCodingRateReduction forward pass."""

    def __init__(self, eps=0.01, gamma=1.0, compress_only=False,
                 block_m=None, num_splits=2):
        self.eps = float(eps)
        self.gamma = gamma            # kept for parity with the PyTorch module (unused)
        self.compress_only = compress_only
        self.block_m = block_m
        self.num_splits = num_splits

    def __call__(self, X, Y, num_classes=None):
        X = jnp.asarray(X, jnp.float32)
        m, p = X.shape

        # Pi construction (PyTorch one-hot loop / Y.T reshape) is cheap glue.
        if Y.ndim == 1:
            if num_classes is None:
                num_classes = int(jnp.max(Y)) + 1    # eager only; pass num_classes under jit
            Pi = jax.nn.one_hot(Y, num_classes, dtype=jnp.float32)       # (m, k)
        else:
            if num_classes is None:
                num_classes = Y.shape[1]
            Pi = jnp.asarray(Y, jnp.float32)                             # (m, k)
        k = int(num_classes)

        trPi = jnp.sum(Pi, axis=0) + 1e-8                                # (k,)

        if self.compress_only:
            weights = Pi                                                 # (m, k)
            scales = p / (trPi * self.eps)
        else:
            weights = jnp.concatenate(
                [Pi, jnp.ones((m, 1), jnp.float32)], axis=1)             # (m, k+1)
            scales = jnp.concatenate(
                [p / (trPi * self.eps),
                 jnp.full((1,), p / (m * self.eps), jnp.float32)])       # (k+1,)

        gram = _group_grams(X, weights, block_m=self.block_m,
                            num_splits=self.num_splits)                  # (G, p, p)

        A = jnp.eye(p, dtype=jnp.float32)[None] + scales[:, None, None] * gram
        # TODO(synk): torch.logdet (batched LU/Cholesky factorization) has no clean
        # Pallas TPU equivalent; computed with jnp.linalg.slogdet in XLA.
        _, logabsdet = jnp.linalg.slogdet(A)

        compress_loss = jnp.sum(trPi * logabsdet[:k] / (2.0 * m))
        if self.compress_only:
            return None, compress_loss
        discrimn_loss = logabsdet[k] / 2.0
        return discrimn_loss, compress_loss


def _reference_mcr2(X, Y, num_classes, eps=0.01, compress_only=False):
    """Pure-JAX reference, literal transcription of the PyTorch module."""
    hp = jax.lax.Precision.HIGHEST
    X = jnp.asarray(X, jnp.float32)
    m, p = X.shape
    W = X.T
    if Y.ndim == 1:
        Pi = jax.nn.one_hot(Y, num_classes, dtype=jnp.float32).T.reshape(num_classes, 1, m)
    else:
        Pi = jnp.asarray(Y, jnp.float32).T.reshape(num_classes, 1, -1)
    I = jnp.eye(p, dtype=jnp.float32)
    trPi = Pi.sum(2) + 1e-8                                  # (k, 1)
    scale = (p / (trPi * eps)).reshape(num_classes, 1, 1)
    Wb = W.reshape(1, p, m)
    gram = jnp.einsum("kpm,qm->kpq", Wb * Pi, W, precision=hp)
    log_det = jnp.linalg.slogdet(I + scale * gram)[1]
    compress_loss = jnp.sum(trPi.squeeze() * log_det / (2.0 * m))
    if compress_only:
        return None, compress_loss
    discrimn = jnp.linalg.slogdet(
        I + (p / (m * eps)) * jnp.matmul(W, W.T, precision=hp))[1] / 2.0
    return discrimn, compress_loss


if __name__ == "__main__":
    key = jax.random.PRNGKey(0)
    kx, ky, ks = jax.random.split(key, 3)

    m, p, k = 640, 64, 4                       # m samples, p features, k classes
    X = jax.random.normal(kx, (m, p), dtype=jnp.float32)
    Y = jax.random.randint(ky, (m,), 0, k, dtype=jnp.int32)

    # block_m=256 + num_splits=2 -> grid (2, 2): exercises the multi-tile
    # accumulation, the split partial-sum and the zero-weighted sample padding.
    mcr = MaximalCodingRateReduction(eps=0.01, gamma=1.0, compress_only=False,
                                     block_m=256, num_splits=2)
    discrimn_loss, compress_loss = mcr(X, Y, num_classes=k)
    discrimn_loss, compress_loss = jax.block_until_ready((discrimn_loss, compress_loss))

    ref_d, ref_c = _reference_mcr2(X, Y, k, eps=0.01)
    assert bool(jnp.isfinite(discrimn_loss)) and bool(jnp.isfinite(compress_loss))
    assert jnp.allclose(discrimn_loss, ref_d, rtol=5e-3, atol=1e-2), (discrimn_loss, ref_d)
    assert jnp.allclose(compress_loss, ref_c, rtol=5e-3, atol=1e-2), (compress_loss, ref_c)

    # compress_only path with default (auto) block_m.
    mcr_c = MaximalCodingRateReduction(eps=0.01, compress_only=True)
    none_loss, c_only = mcr_c(X, Y, num_classes=k)
    c_only = jax.block_until_ready(c_only)
    assert none_loss is None
    assert jnp.allclose(c_only, ref_c, rtol=5e-3, atol=1e-2), (c_only, ref_c)

    # Soft-label (2-D Y) path.
    Ysoft = jax.nn.softmax(jax.random.normal(ks, (m, k), dtype=jnp.float32), axis=-1)
    d_s, c_s = MaximalCodingRateReduction(eps=0.01, block_m=256)(X, Ysoft)
    d_s, c_s = jax.block_until_ready((d_s, c_s))
    ref_ds, ref_cs = _reference_mcr2(X, Ysoft, k, eps=0.01)
    assert jnp.allclose(d_s, ref_ds, rtol=5e-3, atol=1e-2), (d_s, ref_ds)
    assert jnp.allclose(c_s, ref_cs, rtol=5e-3, atol=1e-2), (c_s, ref_cs)

    print("KERNEL_OK")
</pallas_src>

<mosaic_0001>
module attributes {stable_mosaic.version = 11 : i64} {
  func.func @_mcr2_gram_kernel(%arg0: i32, %arg1: i32, %arg2: memref<256x128xf32, #tpu.memory_space<vmem>>, %arg3: memref<256x5xf32, #tpu.memory_space<vmem>>, %arg4: memref<1x5x128x128xf32, #tpu.memory_space<vmem>>) attributes {dimension_semantics = [#tpu.dimension_semantics<parallel>, #tpu.dimension_semantics<arbitrary>], iteration_bounds = array<i64: 2, 2>, scalar_prefetch = 0 : i64, scratch_operands = 0 : i64, tpu.core_type = #tpu.core_type<tc>, window_params = [{transform_indices = @transform_0, window_bounds = array<i64: 256, 128>}, {transform_indices = @transform_1, window_bounds = array<i64: 256, 5>}, {transform_indices = @transform_2, window_bounds = array<i64: 1, 5, 128, 128>}]} {
    %c0_i32 = arith.constant 0 : i32
    %0 = arith.cmpi eq, %arg1, %c0_i32 : i32
    %1 = arith.extui %0 : i1 to i32
    %c0_i32_0 = arith.constant 0 : i32
    %2 = arith.cmpi ne, %1, %c0_i32_0 : i32
    scf.if %2 {
      %cst_44 = arith.constant 0.000000e+00 : f32
      %56 = vector.broadcast %cst_44 : f32 to vector<5x128x128xf32>
      %c0_45 = arith.constant 0 : index
      %c0_46 = arith.constant 0 : index
      %c0_47 = arith.constant 0 : index
      %c0_48 = arith.constant 0 : index
      %57 = vector.load %arg4[%c0_45, %c0_46, %c0_47, %c0_48] : memref<1x5x128x128xf32, #tpu.memory_space<vmem>>, vector<1x5x128x128xf32>
      %58 = vector.shape_cast %57 : vector<1x5x128x128xf32> to vector<5x128x128xf32>
      %59 = vector.shape_cast %56 : vector<5x128x128xf32> to vector<1x5x128x128xf32>
      tpu.vector_store %arg4[%c0_45, %c0_46, %c0_47, %c0_48], %59 {strides = array<i32>} : memref<1x5x128x128xf32, #tpu.memory_space<vmem>>, vector<1x5x128x128xf32>,
    } else {
    }
    %c0 = arith.constant 0 : index
    %c0_1 = arith.constant 0 : index
    %3 = vector.load %arg2[%c0, %c0_1] : memref<256x128xf32, #tpu.memory_space<vmem>>, vector<256x128xf32>
    %c0_2 = arith.constant 0 : index
    %c0_3 = arith.constant 0 : index
    %4 = vector.load %arg3[%c0_2, %c0_3] : memref<256x5xf32, #tpu.memory_space<vmem>>, vector<256x5xf32>
    %5 = tpu.transpose %3, [1, 0] : vector<256x128xf32> -> vector<128x256xf32>
    %6 = vector.extract_strided_slice %4 {offsets = [0, 0], sizes = [256, 1], strides = [1, 1]} : vector<256x5xf32> to vector<256x1xf32>
    %7 = vector.broadcast %6 : vector<256x1xf32> to vector<256x128xf32>
    %8 = arith.mulf %3, %7 : vector<256x128xf32>
    %c0_4 = arith.constant 0 : index
    %c0_5 = arith.constant 0 : index
    %c0_6 = arith.constant 0 : index
    %c0_7 = arith.constant 0 : index
    %9 = vector.load %arg4[%c0_4, %c0_5, %c0_6, %c0_7] : memref<1x5x128x128xf32, #tpu.memory_space<vmem>>, vector<1x1x128x128xf32>
    %10 = vector.shape_cast %9 : vector<1x1x128x128xf32> to vector<128x128xf32>
    %cst = arith.constant dense<0.000000e+00> : vector<128x128xf32>
    %11 = tpu.matmul %5, %8, %cst {dimension_numbers = #tpu.dot_dimension_numbers<[1], [0], [0], [1], [0, 0, 1, 1], [], []>} : vector<128x256xf32>, vector<256x128xf32>, vector<128x128xf32> -> vector<128x128xf32>
    %12 = arith.addf %10, %11 : vector<128x128xf32>
    %c0_8 = arith.constant 0 : index
    %c0_9 = arith.constant 0 : index
    %c0_10 = arith.constant 0 : index
    %c0_11 = arith.constant 0 : index
    %13 = vector.load %arg4[%c0_8, %c0_9, %c0_10, %c0_11] : memref<1x5x128x128xf32, #tpu.memory_space<vmem>>, vector<1x1x128x128xf32>
    %14 = vector.shape_cast %13 : vector<1x1x128x128xf32> to vector<128x128xf32>
    %15 = vector.shape_cast %12 : vector<128x128xf32> to vector<1x1x128x128xf32>
    tpu.vector_store %arg4[%c0_8, %c0_9, %c0_10, %c0_11], %15 {strides = array<i32>} : memref<1x5x128x128xf32, #tpu.memory_space<vmem>>, vector<1x1x128x128xf32>,
    %16 = vector.extract_strided_slice %4 {offsets = [0, 1], sizes = [256, 1], strides = [1, 1]} : vector<256x5xf32> to vector<256x1xf32>
    %17 = vector.broadcast %16 : vector<256x1xf32> to vector<256x128xf32>
    %18 = arith.mulf %3, %17 : vector<256x128xf32>
    %c0_12 = arith.constant 0 : index
    %c1 = arith.constant 1 : index
    %c0_13 = arith.constant 0 : index
    %c0_14 = arith.constant 0 : index
    %19 = vector.load %arg4[%c0_12, %c1, %c0_13, %c0_14] : memref<1x5x128x128xf32, #tpu.memory_space<vmem>>, vector<1x1x128x128xf32>
    %20 = vector.shape_cast %19 : vector<1x1x128x128xf32> to vector<128x128xf32>
    %cst_15 = arith.constant dense<0.000000e+00> : vector<128x128xf32>
    %21 = tpu.matmul %5, %18, %cst_15 {dimension_numbers = #tpu.dot_dimension_numbers<[1], [0], [0], [1], [0, 0, 1, 1], [], []>} : vector<128x256xf32>, vector<256x128xf32>, vector<128x128xf32> -> vector<128x128xf32>
    %22 = arith.addf %20, %21 : vector<128x128xf32>
    %c0_16 = arith.constant 0 : index
    %c1_17 = arith.constant 1 : index
    %c0_18 = arith.constant 0 : index
    %c0_19 = arith.constant 0 : index
    %23 = vector.load %arg4[%c0_16, %c1_17, %c0_18, %c0_19] : memref<1x5x128x128xf32, #tpu.memory_space<vmem>>, vector<1x1x128x128xf32>
    %24 = vector.shape_cast %23 : vector<1x1x128x128xf32> to vector<128x128xf32>
    %25 = vector.shape_cast %22 : vector<128x128xf32> to vector<1x1x128x128xf32>
    tpu.vector_store %arg4[%c0_16, %c1_17, %c0_18, %c0_19], %25 {strides = array<i32>} : memref<1x5x128x128xf32, #tpu.memory_space<vmem>>, vector<1x1x128x128xf32>,
    %26 = vector.extract_strided_slice %4 {offsets = [0, 2], sizes = [256, 1], strides = [1, 1]} : vector<256x5xf32> to vector<256x1xf32>
    %27 = vector.broadcast %26 : vector<256x1xf32> to vector<256x128xf32>
    %28 = arith.mulf %3, %27 : vector<256x128xf32>
    %c0_20 = arith.constant 0 : index
    %c2 = arith.constant 2 : index
    %c0_21 = arith.constant 0 : index
    %c0_22 = arith.constant 0 : index
    %29 = vector.load %arg4[%c0_20, %c2, %c0_21, %c0_22] : memref<1x5x128x128xf32, #tpu.memory_space<vmem>>, vector<1x1x128x128xf32>
    %30 = vector.shape_cast %29 : vector<1x1x128x128xf32> to vector<128x128xf32>
    %cst_23 = arith.constant dense<0.000000e+00> : vector<128x128xf32>
    %31 = tpu.matmul %5, %28, %cst_23 {dimension_numbers = #tpu.dot_dimension_numbers<[1], [0], [0], [1], [0, 0, 1, 1], [], []>} : vector<128x256xf32>, vector<256x128xf32>, vector<128x128xf32> -> vector<128x128xf32>
    %32 = arith.addf %30, %31 : vector<128x128xf32>
    %c0_24 = arith.constant 0 : index
    %c2_25 = arith.constant 2 : index
    %c0_26 = arith.constant 0 : index
    %c0_27 = arith.constant 0 : index
    %33 = vector.load %arg4[%c0_24, %c2_25, %c0_26, %c0_27] : memref<1x5x128x128xf32, #tpu.memory_space<vmem>>, vector<1x1x128x128xf32>
    %34 = vector.shape_cast %33 : vector<1x1x128x128xf32> to vector<128x128xf32>
    %35 = vector.shape_cast %32 : vector<128x128xf32> to vector<1x1x128x128xf32>
    tpu.vector_store %arg4[%c0_24, %c2_25, %c0_26, %c0_27], %35 {strides = array<i32>} : memref<1x5x128x128xf32, #tpu.memory_space<vmem>>, vector<1x1x128x128xf32>,
    %36 = vector.extract_strided_slice %4 {offsets = [0, 3], sizes = [256, 1], strides = [1, 1]} : vector<256x5xf32> to vector<256x1xf32>
    %37 = vector.broadcast %36 : vector<256x1xf32> to vector<256x128xf32>
    %38 = arith.mulf %3, %37 : vector<256x128xf32>
    %c0_28 = arith.constant 0 : index
    %c3 = arith.constant 3 : index
    %c0_29 = arith.constant 0 : index
    %c0_30 = arith.constant 0 : index
    %39 = vector.load %arg4[%c0_28, %c3, %c0_29, %c0_30] : memref<1x5x128x128xf32, #tpu.memory_space<vmem>>, vector<1x1x128x128xf32>
    %40 = vector.shape_cast %39 : vector<1x1x128x128xf32> to vector<128x128xf32>
    %cst_31 = arith.constant dense<0.000000e+00> : vector<128x128xf32>
    %41 = tpu.matmul %5, %38, %cst_31 {dimension_numbers = #tpu.dot_dimension_numbers<[1], [0], [0], [1], [0, 0, 1, 1], [], []>} : vector<128x256xf32>, vector<256x128xf32>, vector<128x128xf32> -> vector<128x128xf32>
    %42 = arith.addf %40, %41 : vector<128x128xf32>
    %c0_32 = arith.constant 0 : index
    %c3_33 = arith.constant 3 : index
    %c0_34 = arith.constant 0 : index
    %c0_35 = arith.constant 0 : index
    %43 = vector.load %arg4[%c0_32, %c3_33, %c0_34, %c0_35] : memref<1x5x128x128xf32, #tpu.memory_space<vmem>>, vector<1x1x128x128xf32>
    %44 = vector.shape_cast %43 : vector<1x1x128x128xf32> to vector<128x128xf32>
    %45 = vector.shape_cast %42 : vector<128x128xf32> to vector<1x1x128x128xf32>
    tpu.vector_store %arg4[%c0_32, %c3_33, %c0_34, %c0_35], %45 {strides = array<i32>} : memref<1x5x128x128xf32, #tpu.memory_space<vmem>>, vector<1x1x128x128xf32>,
    %46 = vector.extract_strided_slice %4 {offsets = [0, 4], sizes = [256, 1], strides = [1, 1]} : vector<256x5xf32> to vector<256x1xf32>
    %47 = vector.broadcast %46 : vector<256x1xf32> to vector<256x128xf32>
    %48 = arith.mulf %3, %47 : vector<256x128xf32>
    %c0_36 = arith.constant 0 : index
    %c4 = arith.constant 4 : index
    %c0_37 = arith.constant 0 : index
    %c0_38 = arith.constant 0 : index
    %49 = vector.load %arg4[%c0_36, %c4, %c0_37, %c0_38] : memref<1x5x128x128xf32, #tpu.memory_space<vmem>>, vector<1x1x128x128xf32>
    %50 = vector.shape_cast %49 : vector<1x1x128x128xf32> to vector<128x128xf32>
    %cst_39 = arith.constant dense<0.000000e+00> : vector<128x128xf32>
    %51 = tpu.matmul %5, %48, %cst_39 {dimension_numbers = #tpu.dot_dimension_numbers<[1], [0], [0], [1], [0, 0, 1, 1], [], []>} : vector<128x256xf32>, vector<256x128xf32>, vector<128x128xf32> -> vector<128x128xf32>
    %52 = arith.addf %50, %51 : vector<128x128xf32>
    %c0_40 = arith.constant 0 : index
    %c4_41 = arith.constant 4 : index
    %c0_42 = arith.constant 0 : index
    %c0_43 = arith.constant 0 : index
    %53 = vector.load %arg4[%c0_40, %c4_41, %c0_42, %c0_43] : memref<1x5x128x128xf32, #tpu.memory_space<vmem>>, vector<1x1x128x128xf32>
    %54 = vector.shape_cast %53 : vector<1x1x128x128xf32> to vector<128x128xf32>
    %55 = vector.shape_cast %52 : vector<128x128xf32> to vector<1x1x128x128xf32>
    tpu.vector_store %arg4[%c0_40, %c4_41, %c0_42, %c0_43], %55 {strides = array<i32>} : memref<1x5x128x128xf32, #tpu.memory_space<vmem>>, vector<1x1x128x128xf32>,
    return
  }
  func.func @transform_0(%arg0: i32, %arg1: i32) -> (i32, i32) {
    %c2_i32 = arith.constant 2 : i32
    %0 = arith.muli %arg0, %c2_i32 : i32
    %1 = arith.addi %0, %arg1 : i32
    %c0_i32 = arith.constant 0 : i32
    %c0_i32_0 = arith.constant 0 : i32
    return %1, %c0_i32 : i32, i32
  }
  func.func @transform_1(%arg0: i32, %arg1: i32) -> (i32, i32) {
    %c2_i32 = arith.constant 2 : i32
    %0 = arith.muli %arg0, %c2_i32 : i32
    %1 = arith.addi %0, %arg1 : i32
    %c0_i32 = arith.constant 0 : i32
    %c0_i32_0 = arith.constant 0 : i32
    return %1, %c0_i32 : i32, i32
  }
  func.func @transform_2(%arg0: i32, %arg1: i32) -> (i32, i32, i32, i32) {
    %c0_i32 = arith.constant 0 : i32
    %c0_i32_0 = arith.constant 0 : i32
    %c0_i32_1 = arith.constant 0 : i32
    %c0_i32_2 = arith.constant 0 : i32
    return %arg0, %c0_i32, %c0_i32_0, %c0_i32_1 : i32, i32, i32, i32
  }
}

</mosaic_0001>

<bundles_post_ra>
// kernel: tpu_custom_call.1
= control target key start
LH: loop header
LB: loop body
LE: loop exit
PB: predicated region body
PF: predicated region fallthrough
CT: control target
= control target key end

     0   :  { %7 = vsyncpa [#allocation3], 0  ;;  %s4422_s0 = inlined_call_operand.vmem [shape: f32[1024,128], index: 0, kind: input, shape index: {}]   ;;  %s4423_s1 = inlined_call_operand.vmem [shape: f32[1024,5], index: 1, kind: input, shape index: {}]   ;;  %s4424_s2 = inlined_call_operand.hbm [shape: f32[2,5,128,128], index: 2, kind: output, shape index: {}]  }
   0x1   :  { %9 = vsyncpa [#allocation3 + $0x1], 0  ;;  %s2825_s9 = smov 0   ;;  %s2827_s10 = smov 0  }
   0x2   :  { %s2829_s11 = smov 0   ;;  %s2831_s12 = smov 0  }
   0x3   :  { %s2833_s13 = smov 0   ;;  %s2835_s14 = smov 0  }
   0x4   :  { %s2837_s15 = smov 0   ;;  %s2839_s16 = smov 0  }
   0x5 LB: > { %s2245_s17 = sadd.s32 4294967295, %s2800_s16   ;;  %s2246_s18 = sadd.s32 4294967294, %s2800_s16   ;;  %s2800_s16 = sphi %s2839_s16, %s15_s16   ;;  %s2796_s15 = sphi %s2837_s15, %s4748_s15   ;;  %s2792_s14 = sphi %s2835_s14, %s4747_s14   ;;  %s2788_s13 = sphi %s2833_s13, %s4746_s13   ;;  %s2784_s12 = sphi %s2831_s12, %s4745_s12   ;;  %s2780_s11 = sphi %s2829_s11, %s4744_s11   ;;  %s2776_s10 = sphi %s2827_s10, %s4743_s10   ;;  %s2772_s9 = sphi %s2825_s9, %s4742_s9  }
   0x6   : > { %s24_s19 = sadd.s32 1, %s2792_s14  ;;  %s27_s20 = sadd.s32 1, %s2796_s15 }
   0x7   : > { %p25_p0 = scmp.ge.s32.totalorder %s24_s19, 2  ;;  %p104_p1 = scmp.ne.s32.totalorder %s2780_s11, %s2776_s10 }
   0x8   : > { %p105_p2 = scmp.eq.s32.totalorder %s2245_s17, 3  ;;  %p110_p4 = scmp.ne.s32.totalorder %s2776_s10, %s2772_s9 }
   0x9   : > { %s4750_s19 = smov (%p25_p0, %s24_s19), 0  ;;  %s4752_s20 = smov (!%p25_p0, %s27_s20), %s2796_s15 }
   0xa   : > { %p2874_p3 = por %p105_p2, %p104_p1  ;;  %p29_p5 = scmp.ge.s32.totalorder %s4752_s20, 2 }
   0xb   : > { %p111_p6 = scmp.eq.s32.totalorder %s2246_s18, 3  ;;  %p2253_p7 = scmp.ge.s32.totalorder %s2800_s16, 1 }
   0xc   : > { %p155_p8 = scmp.lt.s32.totalorder %s2800_s16, 5  ;;  %s4754_s20 = smov (%p29_p5, %s4752_s20), 0 }
   0xd   : > { %p2884_p9 = por %p111_p6, %p110_p4  ;;  %s91_s23 = ssub.s32 %s2796_s15, %s4754_s20 }
   0xe   : > { %p156_p10 = pnand %p2253_p7, %p155_p8  ;;  %s94_s24 = sadd.s32 1, %s2780_s11 }
   0xf   : > { %p92_p11 = scmp.eq.s32.totalorder %s91_s23, 0 }
  0x10   : > { %159 = sbr.rel (%p156_p10) target bundleno = 1008 (0x3f0), region = 28 }
  0x11   : > { %s2892_s25 = scalar_select %p92_p11, %s2780_s11, %s94_s24  }
  0x15   : > { %s183_s26 = sand.u32 1, %s2776_s10   ;;  %s2254_s27 = sshll.u32 %s2788_s13, 1 }
  0x16   : > { %s2424_s28 = smul.u32 640, %s183_s26  ;;  %s187_s29 = sadd.s32 %s2784_s12, %s2254_s27 }
  0x17   : > { %s2255_s30 = sshll.u32 %s187_s29, 5  ;;  %p2260_p13 = scmp.ne.s32.totalorder %s2784_s12, 0 }
  0x18   : > { %p189_p12 = scmp.lt.s32.totalorder %s2255_s30, 127  ;;  %s2909_s18 = scalar_lea.vmem [#allocation2], %s2424_s28 }
  0x19   : > { %209 = sbr.rel (%p2260_p13) target bundleno = 111 (0x6f), region = 32 }
  0x1a   : > { %s4756_s30 = smov (!%p189_p12, %s2255_s30), 127 }
  0x1b   : > { %s2256_s3 = sshll.u32 %s4756_s30, 3 }
  0x1c   : > { %s2902_s6 = scalar_lea.vmem %s4422_s0, %s2256_s3  ;;  %s2907_s17 = scalar_lea.vmem %s4423_s1, %s2256_s3 }
  0x1e   : > { %v2802_v0 = vmov 0.0  }
  0x1f   : > { %210 = vst [vmem:[%s2909_s18] sm:$0xff] %v2802_v0 }
  0x20   : > { %211 = vst [vmem:[%s2909_s18 + $0x8] sm:$0xff] %v2802_v0 }
  0x21   : > { %212 = vst [vmem:[%s2909_s18 + $0x10] sm:$0xff] %v2802_v0 }
  0x22   : > { %213 = vst [vmem:[%s2909_s18 + $0x18] sm:$0xff] %v2802_v0 }
  0x23   : > { %214 = vst [vmem:[%s2909_s18 + $0x20] sm:$0xff] %v2802_v0 }
  0x24   : > { %215 = vst [vmem:[%s2909_s18 + $0x28] sm:$0xff] %v2802_v0 }
  0x25   : > { %216 = vst [vmem:[%s2909_s18 + $0x30] sm:$0xff] %v2802_v0 }
  0x26   : > { %217 = vst [vmem:[%s2909_s18 + $0x38] sm:$0xff] %v2802_v0 }
  0x27   : > { %218 = vst [vmem:[%s2909_s18 + $0x40] sm:$0xff] %v2802_v0 }
  0x28   : > { %219 = vst [vmem:[%s2909_s18 + $0x48] sm:$0xff] %v2802_v0 }
  0x29   : > { %220 = vst [vmem:[%s2909_s18 + $0x50] sm:$0xff] %v2802_v0 }
  0x2a   : > { %221 = vst [vmem:[%s2909_s18 + $0x58] sm:$0xff] %v2802_v0 }
  0x2b   : > { %222 = vst [vmem:[%s2909_s18 + $0x60] sm:$0xff] %v2802_v0 }
  0x2c   : > { %223 = vst [vmem:[%s2909_s18 + $0x68] sm:$0xff] %v2802_v0 }
  0x2d   : > { %224 = vst [vmem:[%s2909_s18 + $0x70] sm:$0xff] %v2802_v0 }
  0x2e   : > { %225 = vst [vmem:[%s2909_s18 + $0x78] sm:$0xff] %v2802_v0 }
  0x2f   : > { %226 = vst [vmem:[%s2909_s18 + $0x80] sm:$0xff] %v2802_v0 }
  0x30   : > { %227 = vst [vmem:[%s2909_s18 + $0x88] sm:$0xff] %v2802_v0 }
  0x31   : > { %228 = vst [vmem:[%s2909_s18 + $0x90] sm:$0xff] %v2802_v0 }
  0x32   : > { %229 = vst [vmem:[%s2909_s18 + $0x98] sm:$0xff] %v2802_v0 }
  0x33   : > { %230 = vst [vmem:[%s2909_s18 + $0xa0] sm:$0xff] %v2802_v0 }
  0x34   : > { %231 = vst [vmem:[%s2909_s18 + $0xa8] sm:$0xff] %v2802_v0 }
  0x35   : > { %232 = vst [vmem:[%s2909_s18 + $0xb0] sm:$0xff] %v2802_v0 }
  0x36   : > { %233 = vst [vmem:[%s2909_s18 + $0xb8] sm:$0xff] %v2802_v0 }
  0x37   : > { %234 = vst [vmem:[%s2909_s18 + $0xc0] sm:$0xff] %v2802_v0 }
  0x38   : > { %235 = vst [vmem:[%s2909_s18 + $0xc8] sm:$0xff] %v2802_v0 }
  0x39   : > { %236 = vst [vmem:[%s2909_s18 + $0xd0] sm:$0xff] %v2802_v0 }
  0x3a   : > { %237 = vst [vmem:[%s2909_s18 + $0xd8] sm:$0xff] %v2802_v0 }
  0x3b   : > { %238 = vst [vmem:[%s2909_s18 + $0xe0] sm:$0xff] %v2802_v0 }
  0x3c   : > { %239 = vst [vmem:[%s2909_s18 + $0xe8] sm:$0xff] %v2802_v0 }
  0x3d   : > { %240 = vst [vmem:[%s2909_s18 + $0xf0] sm:$0xff] %v2802_v0 }
  0x3e   : > { %241 = vst [vmem:[%s2909_s18 + $0xf8] sm:$0xff] %v2802_v0 }
  0x3f   : > { %242 = vst [vmem:[%s2909_s18 + $0x100] sm:$0xff] %v2802_v0 }
  0x40   : > { %243 = vst [vmem:[%s2909_s18 + $0x108] sm:$0xff] %v2802_v0 }
  0x41   : > { %244 = vst [vmem:[%s2909_s18 + $0x110] sm:$0xff] %v2802_v0 }
  0x42   : > { %245 = vst [vmem:[%s2909_s18 + $0x118] sm:$0xff] %v2802_v0 }
  0x43   : > { %246 = vst [vmem:[%s2909_s18 + $0x120] sm:$0xff] %v2802_v0 }
  0x44   : > { %247 = vst [vmem:[%s2909_s18 + $0x128] sm:$0xff] %v2802_v0 }
  0x45   : > { %248 = vst [vmem:[%s2909_s18 + $0x130] sm:$0xff] %v2802_v0 }
  0x46   : > { %249 = vst [vmem:[%s2909_s18 + $0x138] sm:$0xff] %v2802_v0 }
  0x47   : > { %250 = vst [vmem:[%s2909_s18 + $0x140] sm:$0xff] %v2802_v0 }
  0x48   : > { %251 = vst [vmem:[%s2909_s18 + $0x148] sm:$0xff] %v2802_v0 }
  0x49   : > { %252 = vst [vmem:[%s2909_s18 + $0x150] sm:$0xff] %v2802_v0 }
  0x4a   : > { %253 = vst [vmem:[%s2909_s18 + $0x158] sm:$0xff] %v2802_v0 }
  0x4b   : > { %254 = vst [vmem:[%s2909_s18 + $0x160] sm:$0xff] %v2802_v0 }
  0x4c   : > { %255 = vst [vmem:[%s2909_s18 + $0x168] sm:$0xff] %v2802_v0 }
  0x4d   : > { %256 = vst [vmem:[%s2909_s18 + $0x170] sm:$0xff] %v2802_v0 }
  0x4e   : > { %257 = vst [vmem:[%s2909_s18 + $0x178] sm:$0xff] %v2802_v0 }
  0x4f   : > { %258 = vst [vmem:[%s2909_s18 + $0x180] sm:$0xff] %v2802_v0 }
  0x50   : > { %259 = vst [vmem:[%s2909_s18 + $0x188] sm:$0xff] %v2802_v0 }
  0x51   : > { %260 = vst [vmem:[%s2909_s18 + $0x190] sm:$0xff] %v2802_v0 }
  0x52   : > { %261 = vst [vmem:[%s2909_s18 + $0x198] sm:$0xff] %v2802_v0 }
  0x53   : > { %262 = vst [vmem:[%s2909_s18 + $0x1a0] sm:$0xff] %v2802_v0 }
  0x54   : > { %263 = vst [vmem:[%s2909_s18 + $0x1a8] sm:$0xff] %v2802_v0 }
  0x55   : > { %264 = vst [vmem:[%s2909_s18 + $0x1b0] sm:$0xff] %v2802_v0 }
  0x56   : > { %265 = vst [vmem:[%s2909_s18 + $0x1b8] sm:$0xff] %v2802_v0 }
  0x57   : > { %266 = vst [vmem:[%s2909_s18 + $0x1c0] sm:$0xff] %v2802_v0 }
  0x58   : > { %267 = vst [vmem:[%s2909_s18 + $0x1c8] sm:$0xff] %v2802_v0 }
  0x59   : > { %268 = vst [vmem:[%s2909_s18 + $0x1d0] sm:$0xff] %v2802_v0 }
  0x5a   : > { %269 = vst [vmem:[%s2909_s18 + $0x1d8] sm:$0xff] %v2802_v0 }
  0x5b   : > { %270 = vst [vmem:[%s2909_s18 + $0x1e0] sm:$0xff] %v2802_v0 }
  0x5c   : > { %271 = vst [vmem:[%s2909_s18 + $0x1e8] sm:$0xff] %v2802_v0 }
  0x5d   : > { %272 = vst [vmem:[%s2909_s18 + $0x1f0] sm:$0xff] %v2802_v0 }
  0x5e   : > { %273 = vst [vmem:[%s2909_s18 + $0x1f8] sm:$0xff] %v2802_v0 }
  0x5f   : > { %274 = vst [vmem:[%s2909_s18 + $0x200] sm:$0xff] %v2802_v0 }
  0x60   : > { %275 = vst [vmem:[%s2909_s18 + $0x208] sm:$0xff] %v2802_v0 }
  0x61   : > { %276 = vst [vmem:[%s2909_s18 + $0x210] sm:$0xff] %v2802_v0 }
  0x62   : > { %277 = vst [vmem:[%s2909_s18 + $0x218] sm:$0xff] %v2802_v0 }
  0x63   : > { %278 = vst [vmem:[%s2909_s18 + $0x220] sm:$0xff] %v2802_v0 }
  0x64   : > { %279 = vst [vmem:[%s2909_s18 + $0x228] sm:$0xff] %v2802_v0 }
  0x65   : > { %280 = vst [vmem:[%s2909_s18 + $0x230] sm:$0xff] %v2802_v0 }
  0x66   : > { %281 = vst [vmem:[%s2909_s18 + $0x238] sm:$0xff] %v2802_v0 }
  0x67   : > { %282 = vst [vmem:[%s2909_s18 + $0x240] sm:$0xff] %v2802_v0 }
  0x68   : > { %283 = vst [vmem:[%s2909_s18 + $0x248] sm:$0xff] %v2802_v0 }
  0x69   : > { %284 = vst [vmem:[%s2909_s18 + $0x250] sm:$0xff] %v2802_v0 }
  0x6a   : > { %285 = vst [vmem:[%s2909_s18 + $0x258] sm:$0xff] %v2802_v0 }
  0x6b   : > { %286 = vst [vmem:[%s2909_s18 + $0x260] sm:$0xff] %v2802_v0 }
  0x6c   : > { %287 = vst [vmem:[%s2909_s18 + $0x268] sm:$0xff] %v2802_v0 }
  0x6d   : > { %288 = vst [vmem:[%s2909_s18 + $0x270] sm:$0xff] %v2802_v0 }
  0x6e   : > { %289 = vst [vmem:[%s2909_s18 + $0x278] sm:$0xff] %v2802_v0 }
  0x6f PF: > { %v3073_v1 = vld [vmem:[%s2907_s17 + $0x10] sm:$0xff]  ;;  %v3076_v2 = vld [vmem:[%s2907_s17] sm:$0xff]  ;;  %v2803_v4 = vmov 0   ;;  %v3089_v7 = vld [vmem:[%s2902_s6 + $0x8] sm:$0xff]  ;;  %s2425_s12 = smul.u32 640, %s2788_s13  ;;  %s2157_s28 = sshll.u32 %s2909_s18, 4  ;;  %s2158_s28 = int_to_ptr.vmem [resolvable:$true] %s2157_s28 }
  0x70   : > { %v3079_v3 = vld [vmem:[%s2902_s6] sm:$0xff]  ;;  %2506 = vset.pattern.permute.xlu2 %v2803_v4  ;;  %2505 = vset.pattern.permute.xlu1 %v2803_v4  ;;  %4567 = vst [vmem:[#allocation7_spill] sm:$0xff] %v3089_v7  ;;  %v3092_v8 = vld [vmem:[%s2902_s6 + $0x88] sm:$0xff]  ;;  %v3095_v9 = vld [vmem:[%s2907_s17 + $0x18] sm:$0xff]  ;;  %s2145_s13 = scalar_lea.sflag [#allocation3], %s183_s26 }
  0x71   : > { %4565 = vst [vmem:[#allocation5_spill] sm:$0xff] %v3079_v3  ;;  %v3082_v5 = vld [vmem:[%s2902_s6 + $0x80] sm:$0xff]  ;;  %430 = vperm.xlu2 %2506, %v3073_v1   ;;  %420 = vperm.xlu1 %2505, %v3076_v2   ;;  %v3098_v10 = vld [vmem:[%s2907_s17 + $0x8] sm:$0xff]  ;;  %v2509_v11 = vpack.i.bf16 %v3092_v8, %v3089_v7  ;;  %v3105_v12 = vld [vmem:[%s2902_s6 + $0x10] sm:$0xff]  ;;  %s2156_s27 = scalar_lea.hbm %s4424_s2, %s2425_s12 }
  0x72   : > { %4566 = vst [vmem:[#allocation6_spill] sm:$0xff] %v3082_v5  ;;  %v2507_v6 = vpack.i.bf16 %v3082_v5, %v3079_v3  ;;  %v3108_v13 = vld [vmem:[%s2902_s6 + $0x90] sm:$0xff]  ;;  %v3111_v14 = vld [vmem:[%s2907_s17 + $0x28] sm:$0xff]  ;;  %v3114_v15 = vld [vmem:[%s2907_s17 + $0x20] sm:$0xff]  ;;  %s2159_s29 = sshll.u32 %s2156_s27, 4  ;;  %s2160_s29 = int_to_ptr.hbm [resolvable:$true] %s2159_s29 }
  0x73   : > { %4568 = vst [vmem:[#allocation8_spill] sm:$0xff] %v3092_v8  ;;  %v2511_v16 = vpack.i.bf16 %v3108_v13, %v3105_v12  ;;  %v3121_v17 = vld [vmem:[%s2902_s6 + $0x18] sm:$0xff]  ;;  %v3130_v20 = vld [vmem:[%s2907_s17 + $0x30] sm:$0xff]  ;;  %v3137_v22 = vld [vmem:[%s2902_s6 + $0x20] sm:$0xff]  ;;  %s2720_s30 = sshra.s32 %s2160_s29, 4  ;;  %s2721_s30 = int_to_ptr.hbm [resolvable:$true] %s2720_s30 }
  0x74   : > { %2508 = vxpose.xlu0.b32.start [1/16] %v2507_v6, 128  ;;  %4569 = vst [vmem:[#allocation9_spill] sm:$0xff] %v3095_v9  ;;  %v3124_v18 = vld [vmem:[%s2902_s6 + $0x98] sm:$0xff]  ;;  %v3140_v23 = vld [vmem:[%s2902_s6 + $0xa0] sm:$0xff]  ;;  %v3143_v24 = vld [vmem:[%s2907_s17 + $0x48] sm:$0xff]  ;;  %s2722_s3 = scalar_lea.hbm %s2721_s30, 640  ;;  %p2727_p4 = scmp.lt.s32.totalorder %s2721_s30, %s4424_s2 }
  0x75   : > { %4570 = vst [vmem:[#allocation10_spill] sm:$0xff] %v3098_v10  ;;  %v3127_v19 = vld [vmem:[%s2907_s17 + $0x38] sm:$0xff]  ;;  %v2513_v21 = vpack.i.bf16 %v3124_v18, %v3121_v17  ;;  %v3146_v25 = vld [vmem:[%s2907_s17 + $0x40] sm:$0xff]  ;;  %v2515_v26 = vpack.i.bf16 %v3140_v23, %v3137_v22  ;;  %v3153_v27 = vld [vmem:[%s2902_s6 + $0x28] sm:$0xff]  ;;  %p2723_p0 = scmp.ne.s32.totalorder %s2721_s30, %s2722_s3 }
  0x76   : > { %4571 = vst [vmem:[#allocation11_spill] sm:$0xff] %v3105_v12  ;;  %v3156_v28 = vld [vmem:[%s2902_s6 + $0xa8] sm:$0xff]  ;;  %v3159_v29 = vld [vmem:[%s2907_s17 + $0x58] sm:$0xff]  ;;  %v3162_v30 = vld [vmem:[%s2907_s17 + $0x50] sm:$0xff] }
  0x77   : > { %4572 = vst [vmem:[#allocation12_spill] sm:$0xff] %v3108_v13  ;;  %v2517_v31 = vpack.i.bf16 %v3156_v28, %v3153_v27  ;;  %v3169_v32 = vld [vmem:[%s2902_s6 + $0x30] sm:$0xff]  ;;  %v3175_v34 = vld [vmem:[%s2907_s17 + $0x68] sm:$0xff]  ;;  %v3178_v35 = vld [vmem:[%s2907_s17 + $0x60] sm:$0xff]  ;;  %p2724_p1 = pnand %p2723_p0, %p2874_p3 }
  0x78   : > { %4573 = vst [vmem:[#allocation13_spill] sm:$0xff] %v3114_v15  ;;  %v3172_v33 = vld [vmem:[%s2902_s6 + $0xb0] sm:$0xff]  ;;  %v3185_v37 = vld [vmem:[%s2902_s6 + $0x38] sm:$0xff]  ;;  %v3201_v42 = vld [vmem:[%s2902_s6 + $0x40] sm:$0xff] }
  0x79   : > { %435 = vperm.xlu2 %2506, %v3095_v9   ;;  %425 = vperm.xlu1 %2505, %v3098_v10   ;;  %4574 = vst [vmem:[#allocation14_spill] sm:$0xff] %v3121_v17  ;;  %v2519_v36 = vpack.i.bf16 %v3172_v33, %v3169_v32  ;;  %v3188_v38 = vld [vmem:[%s2902_s6 + $0xb8] sm:$0xff]  ;;  %v3194_v40 = vld [vmem:[%s2907_s17 + $0x70] sm:$0xff]  ;;  %v3204_v43 = vld [vmem:[%s2902_s6 + $0xc0] sm:$0xff]  ;;  %p2725_p2 = pneg %p2724_p1 }
  0x7a   : > { %4575 = vst [vmem:[#allocation15_spill] sm:$0xff] %v3124_v18  ;;  %v3191_v39 = vld [vmem:[%s2907_s17 + $0x78] sm:$0xff]  ;;  %v2521_v41 = vpack.i.bf16 %v3188_v38, %v3185_v37  ;;  %v3207_v44 = vld [vmem:[%s2907_s17 + $0x88] sm:$0xff]  ;;  %v3210_v45 = vld [vmem:[%s2907_s17 + $0x80] sm:$0xff]  ;;  %v2523_v46 = vpack.i.bf16 %v3204_v43, %v3201_v42 }
  0x7b   : > { %4576 = vst [vmem:[#allocation16_spill] sm:$0xff] %v3127_v19  ;;  %v3217_v47 = vld [vmem:[%s2902_s6 + $0x48] sm:$0xff]  ;;  %v3223_v49 = vld [vmem:[%s2907_s17 + $0x98] sm:$0xff]  ;;  %v3226_v50 = vld [vmem:[%s2907_s17 + $0x90] sm:$0xff] }
  0x7c   : > { %2510 = vxpose.xlu0.b32.cont [2/16] %v2509_v11, 128  ;;  %4577 = vst [vmem:[#allocation17_spill] sm:$0xff] %v3130_v20  ;;  %v3220_v48 = vld [vmem:[%s2902_s6 + $0xc8] sm:$0xff]  ;;  %v3233_v52 = vld [vmem:[%s2902_s6 + $0x50] sm:$0xff]  ;;  %v3242_v55 = vld [vmem:[%s2907_s17 + $0xa0] sm:$0xff] }
  0x7d   : > { %4578 = vst [vmem:[#allocation18_spill] sm:$0xff] %v3140_v23  ;;  %v2525_v51 = vpack.i.bf16 %v3220_v48, %v3217_v47  ;;  %v3236_v53 = vld [vmem:[%s2902_s6 + $0xd0] sm:$0xff]  ;;  %v3239_v54 = vld [vmem:[%s2907_s17 + $0xa8] sm:$0xff]  ;;  %v3249_v57 = vld [vmem:[%s2902_s6 + $0x58] sm:$0xff] }
  0x7e   : > { %4579 = vst [vmem:[#allocation19_spill] sm:$0xff] %v3143_v24  ;;  %v2527_v56 = vpack.i.bf16 %v3236_v53, %v3233_v52  ;;  %v3252_v58 = vld [vmem:[%s2902_s6 + $0xd8] sm:$0xff]  ;;  %v3258_v60 = vld [vmem:[%s2907_s17 + $0xb0] sm:$0xff]  ;;  %v3267_v63 = vld [vmem:[%s2902_s6 + $0x60] sm:$0xff] }
  0x7f   : > { %4580 = vst [vmem:[#allocation20_spill] sm:$0xff] %v3156_v28  ;;  %v3255_v59 = vld [vmem:[%s2907_s17 + $0xb8] sm:$0xff]  ;;  %v2529_v61 = vpack.i.bf16 %v3252_v58, %v3249_v57  ;;  %v3270_v0 = vld [vmem:[%s2902_s6 + $0xe0] sm:$0xff]  ;;  %v3273_v4 = vld [vmem:[%s2907_s17 + $0xc8] sm:$0xff] }
  0x80   : > { %4581 = vst [vmem:[#allocation21_spill] sm:$0xff] %v3162_v30  ;;  %v3276_v6 = vld [vmem:[%s2907_s17 + $0xc0] sm:$0xff]  ;;  %v2531_v11 = vpack.i.bf16 %v3270_v0, %v3267_v63  ;;  %v3323_v13 = vld [vmem:[%s2902_s6 + $0x78] sm:$0xff]  ;;  %v3332_v28 = vld [vmem:[%s2907_s17 + $0xf0] sm:$0xff] }
  0x81   : > { %445 = vperm.xlu2 %2506, %v3111_v14   ;;  %440 = vperm.xlu1 %2505, %v3114_v15   ;;  %4582 = vst [vmem:[#allocation22_spill] sm:$0xff] %v3172_v33  ;;  %v3326_v18 = vld [vmem:[%s2902_s6 + $0xf8] sm:$0xff] }
  0x82   : > { %4583 = vst [vmem:[#allocation23_spill] sm:$0xff] %v3178_v35  ;;  %v3329_v23 = vld [vmem:[%s2907_s17 + $0xf8] sm:$0xff]  ;;  %v2537_v33 = vpack.i.bf16 %v3326_v18, %v3323_v13 }
  0x83   : > { %4584 = vst [vmem:[#allocation24_spill] sm:$0xff] %v3188_v38 }
  0x84   : > { %2512 = vxpose.xlu0.b32.cont [3/16] %v2511_v16, 128  ;;  %4585 = vst [vmem:[#allocation25_spill] sm:$0xff] %v3204_v43  ;;  %v4447_v43 = vmov 1  }
  0x85   : > { %4586 = vst [vmem:[#allocation26_spill] sm:$0xff] %v3220_v48 }
  0x86   : > { %4587 = vst [vmem:[#allocation27_spill] sm:$0xff] %v3236_v53 }
  0x87   : > { %4588 = vst [vmem:[#allocation28_spill] sm:$0xff] %v3239_v54 }
  0x88   : > { %4589 = vst [vmem:[#allocation29_spill] sm:$0xff] %v3252_v58 }
  0x89   : > { %455 = vperm.xlu2 %2506, %v3127_v19   ;;  %450 = vperm.xlu1 %2505, %v3130_v20   ;;  %4590 = vst [vmem:[#allocation30_spill] sm:$0xff] %v3258_v60 }
  0x8a   : > { %4591 = vst [vmem:[#allocation31_spill] sm:$0xff] %v3270_v0 }
  0x8b   : > { %4594 = vst [vmem:[#allocation34_spill] sm:$0xff] %v3323_v13 }
  0x8c   : > { %2514 = vxpose.xlu0.b32.cont [4/16] %v2513_v21, 128  ;;  %v3285_v21 = vld [vmem:[%s2902_s6 + $0x68] sm:$0xff]  ;;  %4595 = vst [vmem:[#allocation35_spill] sm:$0xff] %v3326_v18 }
  0x8d   : > { %4596 = vst [vmem:[#allocation36_spill] sm:$0xff] %v3329_v23 }
  0x8e   : > { %4597 = vst [vmem:[#allocation37_spill] sm:$0xff] %v3332_v28 }
  0x91   : > { %465 = vperm.xlu2 %2506, %v3143_v24   ;;  %460 = vperm.xlu1 %2505, %v3146_v25  }
  0x94   : > { %2516 = vxpose.xlu0.b32.cont [5/16] %v2515_v26, 128  ;;  %v3288_v26 = vld [vmem:[%s2902_s6 + $0xe8] sm:$0xff] }
  0x95   : > { %4592 = vst [vmem:[#allocation32_spill] sm:$0xff] %v3288_v26 }
  0x99   : > { %475 = vperm.xlu2 %2506, %v3159_v29   ;;  %470 = vperm.xlu1 %2505, %v3162_v30  }
  0x9c   : > { %2518 = vxpose.xlu0.b32.cont [6/16] %v2517_v31, 128  ;;  %v3291_v31 = vld [vmem:[%s2907_s17 + $0xd8] sm:$0xff] }
  0xa1   : > { %485 = vperm.xlu2 %2506, %v3175_v34   ;;  %480 = vperm.xlu1 %2505, %v3178_v35  }
  0xa4   : > { %2520 = vxpose.xlu0.b32.cont [7/16] %v2519_v36, 128  ;;  %v3294_v36 = vld [vmem:[%s2907_s17 + $0xd0] sm:$0xff] }
  0xa9   : > { %495 = vperm.xlu2 %2506, %v3191_v39   ;;  %490 = vperm.xlu1 %2505, %v3194_v40  }
  0xac   : > { %2522 = vxpose.xlu0.b32.cont [8/16] %v2521_v41, 128  ;;  %v2533_v41 = vpack.i.bf16 %v3288_v26, %v3285_v21 }
  0xb1   : > { %505 = vperm.xlu2 %2506, %v3207_v44   ;;  %500 = vperm.xlu1 %2505, %v3210_v45  }
  0xb4   : > { %2524 = vxpose.xlu0.b32.cont [9/16] %v2523_v46, 128 }
  0xb9   : > { %515 = vperm.xlu2 %2506, %v3223_v49   ;;  %510 = vperm.xlu1 %2505, %v3226_v50  }
  0xbc   : > { %2526 = vxpose.xlu0.b32.cont [10/16] %v2525_v51, 128  ;;  %v3303_v51 = vld [vmem:[%s2902_s6 + $0x70] sm:$0xff] }
  0xc1   : > { %525 = vperm.xlu2 %2506, %v3239_v54   ;;  %520 = vperm.xlu1 %2505, %v3242_v55  }
  0xc4   : > { %2528 = vxpose.xlu0.b32.cont [11/16] %v2527_v56, 128  ;;  %v3306_v56 = vld [vmem:[%s2902_s6 + $0xf0] sm:$0xff] }
  0xc5   : > { %4593 = vst [vmem:[#allocation33_spill] sm:$0xff] %v3306_v56  ;;  %v2535_v5 = vpack.i.bf16 %v3306_v56, %v3303_v51 }
  0xc9   : > { %535 = vperm.xlu2 %2506, %v3255_v59   ;;  %530 = vperm.xlu1 %2505, %v3258_v60  }
  0xcb   : > { %v3264_v62 = vpop.permute.xlu2 %430 }
  0xcc   : > { %2530 = vxpose.xlu0.b32.cont [12/16] %v2529_v61, 128  ;;  %v3309_v61 = vld [vmem:[%s2907_s17 + $0xe8] sm:$0xff] }
  0xd1   : > { %545 = vperm.xlu2 %2506, %v3273_v4   ;;  %540 = vperm.xlu1 %2505, %v3276_v6  }
  0xd3   : > { %v3282_v16 = vpop.permute.xlu2 %435 }
  0xd4   : > { %2532 = vxpose.xlu0.b32.cont [13/16] %v2531_v11, 128  ;;  %v3312_v11 = vld [vmem:[%s2907_s17 + $0xe0] sm:$0xff] }
  0xd9   : > { %555 = vperm.xlu2 %2506, %v3291_v31   ;;  %550 = vperm.xlu1 %2505, %v3294_v36  }
  0xdb   : > { %v3300_v46 = vpop.permute.xlu2 %445 }
  0xdc   : > { %2534 = vxpose.xlu0.b32.cont [14/16] %v2533_v41, 128 }
  0xe1   : > { %565 = vperm.xlu2 %2506, %v3309_v61   ;;  %560 = vperm.xlu1 %2505, %v3312_v11  }
  0xe3   : > { %v3318_v8 = vpop.permute.xlu2 %455  ;;  %v3320_v41 = vpop.permute.xlu1 %420 }
  0xe4   : > { %2536 = vxpose.xlu0.b32.cont [15/16] %v2535_v5, 128 }
  0xe9   : > { %575 = vperm.xlu2 %2506, %v3329_v23   ;;  %570 = vperm.xlu1 %2505, %v3332_v28  }
  0xeb   : > { %v466_v5 = vpop.permute.xlu2 %465  ;;  %v3338_v38 = vpop.permute.xlu1 %425 }
  0xec   : > { %2538 = vxpose.xlu0.b32.end [16/16] %v2537_v33, 128 }
  0xf1   : > { %2621 = vset.pattern.permute.xlu2 %v4447_v43  ;;  %2620 = vset.pattern.permute.xlu1 %v4447_v43 }
  0xf2   : > { %797 = vperm.xlu2 %2621, %v3073_v1   ;;  %793 = vperm.xlu1 %2620, %v3098_v10  }
  0xf3   : > { %v476_v48 = vpop.permute.xlu2 %475  ;;  %v3344_v53 = vpop.permute.xlu1 %440 }
  0xfa   : > { %805 = vperm.xlu2 %2621, %v3114_v15   ;;  %801 = vperm.xlu1 %2620, %v3095_v9  }
  0xfb   : > { %v486_v33 = vpop.permute.xlu2 %485  ;;  %v451_v58 = vpop.permute.xlu1 %450 }
 0x102   : > { %813 = vperm.xlu2 %2621, %v3130_v20   ;;  %809 = vperm.xlu1 %2620, %v3111_v14  }
 0x103   : > { %v496_v28 = vpop.permute.xlu2 %495  ;;  %v461_v23 = vpop.permute.xlu1 %460 }
 0x104   : > { %v593_v43 = vmul.f32 %v496_v28, %v3323_v13 }
 0x106   : > { %626 = vmatpush.msra.mxu0 %v593_v43  ;;  %2392 = vmatpush.msra.mxu2 %v593_v43 }
 0x10a   : > { %821 = vperm.xlu2 %2621, %v3146_v25   ;;  %817 = vperm.xlu1 %2620, %v3127_v19   ;;  %v591_v19 = vmul.f32 %v486_v33, %v3285_v21 }
 0x10b   : > { %v3353_v10 = vpop.permute.xlu2 %505  ;;  %v471_v15 = vpop.permute.xlu1 %470 }
 0x112   : > { %829 = vperm.xlu2 %2621, %v3162_v30   ;;  %825 = vperm.xlu1 %2620, %v3143_v24  }
 0x113   : > { %v3357_v20 = vpop.permute.xlu2 %515  ;;  %v481_v9 = vpop.permute.xlu1 %480 }
 0x114   : > { %v590_v24 = vmul.f32 %v481_v9, %v3267_v63  ;;  %v587_v9 = vmul.f32 %v466_v5, %v3217_v47  ;;  %v584_v5 = vmul.f32 %v451_v58, %v3169_v32 }
 0x11a   : > { %837 = vperm.xlu2 %2621, %v3178_v35   ;;  %833 = vperm.xlu1 %2620, %v3159_v29  }
 0x11b   : > { %v3361_v28 = vpop.permute.xlu2 %525  ;;  %v491_v43 = vpop.permute.xlu1 %490 }
 0x11c   : > { %v592_v13 = vmul.f32 %v491_v43, %v3303_v51  ;;  %v589_v43 = vmul.f32 %v476_v48, %v3249_v57 }
 0x11e   : > { %627 = vmatpush.msra.mxu0 %v592_v13  ;;  %2393 = vmatpush.msra.mxu2 %v592_v13  ;;  %v588_v13 = vmul.f32 %v471_v15, %v3233_v52  ;;  %v585_v15 = vmul.f32 %v3318_v8, %v3185_v37 }
 0x120   : > { %628 = vmatpush.msra.mxu0 %v591_v19  ;;  %2394 = vmatpush.msra.mxu2 %v591_v19  ;;  %v586_v19 = vmul.f32 %v461_v23, %v3201_v42  ;;  %v583_v23 = vmul.f32 %v3300_v46, %v3153_v27  ;;  %v581_v46 = vmul.f32 %v3282_v16, %v3121_v17  ;;  %v4606_v17 = vld [vmem:[#allocation36_spill] sm:$0xff] }
 0x122   : > { %845 = vperm.xlu2 %2621, %v3194_v40   ;;  %841 = vperm.xlu1 %2620, %v3175_v34  }
 0x123   : > { %629 = vmatpush.msra.mxu0 %v590_v24  ;;  %2395 = vmatpush.msra.mxu2 %v590_v24  ;;  %v3368_v35 = vpop.permute.xlu2 %535  ;;  %v3370_v30 = vpop.permute.xlu1 %500 }
 0x124   : > { %v3378_v24 = vpop.trf.xlu0 }
 0x125   : > { %630 = vmatpush.msra.mxu0 %v589_v43  ;;  %2396 = vmatpush.msra.mxu2 %v589_v43  ;;  %v582_v43 = vmul.f32 %v3344_v53, %v3137_v22  ;;  %v580_v53 = vmul.f32 %v3264_v62, %v3105_v12 }
 0x127   : > { %631 = vmatpush.msra.mxu0 %v588_v13  ;;  %2397 = vmatpush.msra.mxu2 %v588_v13 }
 0x129   : > { %632 = vmatpush.msra.mxu0 %v587_v9  ;;  %2398 = vmatpush.msra.mxu2 %v587_v9  ;;  %v579_v9 = vmul.f32 %v3338_v38, %v3089_v7 }
 0x12a   : > { %853 = vperm.xlu2 %2621, %v3210_v45   ;;  %849 = vperm.xlu1 %2620, %v3191_v39  }
 0x12b   : > { %633 = vmatpush.msra.mxu0 %v586_v19  ;;  %2399 = vmatpush.msra.mxu2 %v586_v19  ;;  %v3380_v48 = vpop.permute.xlu2 %545  ;;  %v3382_v33 = vpop.permute.xlu1 %510  ;;  %v3406_v19 = vunpack.i.l.bf16 %v3378_v24 }
 0x12c   : > { %v3393_v13 = vpop.trf.xlu0 }
 0x12d   : > { %634 = vmatpush.msra.mxu0 %v585_v15  ;;  %2400 = vmatpush.msra.mxu2 %v585_v15  ;;  %4598 = vst [vmem:[#allocation38_spill] sm:$0xff] %v3406_v19  ;;  %v578_v15 = vmul.f32 %v3320_v41, %v3079_v3  ;;  %v3418_v38 = vunpack.i.l.bf16 %v3393_v13 }
 0x12f   : > { %635 = vmatpush.msra.mxu0 %v584_v5  ;;  %2401 = vmatpush.msra.mxu2 %v584_v5  ;;  %4599 = vst [vmem:[#allocation39_spill] sm:$0xff] %v3418_v38 }
 0x131   : > { %636 = vmatpush.msra.mxu0 %v583_v23  ;;  %2402 = vmatpush.msra.mxu2 %v583_v23 }
 0x132   : > { %861 = vperm.xlu2 %2621, %v3226_v50   ;;  %857 = vperm.xlu1 %2620, %v3207_v44  }
 0x133   : > { %637 = vmatpush.msra.mxu0 %v582_v43  ;;  %2403 = vmatpush.msra.mxu2 %v582_v43  ;;  %v3395_v8 = vpop.permute.xlu2 %555  ;;  %v3397_v58 = vpop.permute.xlu1 %520 }
 0x134   : > { %v3412_v16 = vpop.trf.xlu0 }
 0x135   : > { %638 = vmatpush.msra.mxu0 %v581_v46  ;;  %2404 = vmatpush.msra.mxu2 %v581_v46 }
 0x137   : > { %639 = vmatpush.msra.mxu0 %v580_v53  ;;  %2405 = vmatpush.msra.mxu2 %v580_v53  ;;  %v3427_v53 = vunpack.i.l.bf16 %v3412_v16 }
 0x139   : > { %640 = vmatpush.msra.mxu0 %v579_v9  ;;  %2406 = vmatpush.msra.mxu2 %v579_v9  ;;  %4600 = vst [vmem:[#allocation40_spill] sm:$0xff] %v3427_v53 }
 0x13a   : > { %869 = vperm.xlu2 %2621, %v3242_v55   ;;  %865 = vperm.xlu1 %2620, %v3223_v49  }
 0x13b   : > { %641 = vmatpush.msra.mxu0 %v578_v15  ;;  %2407 = vmatpush.msra.mxu2 %v578_v15  ;;  %v566_v62 = vpop.permute.xlu2 %565  ;;  %v3414_v5 = vpop.permute.xlu1 %530 }
 0x13c   : > { %642 = vmatmul.f32.vlgmr.msra.gmra.mxu0 %v3406_v19  ;;  %v3423_v46 = vpop.trf.xlu0 }
 0x142   : > { %877 = vperm.xlu2 %2621, %v3258_v60   ;;  %873 = vperm.xlu1 %2620, %v3239_v54  }
 0x143   : > { %v576_v41 = vpop.permute.xlu2 %575  ;;  %v541_v23 = vpop.permute.xlu1 %540 }
 0x144   : > { %v609_v43 = vmul.f32 %v576_v41, %v3326_v18  ;;  %645 = vmatmul.f32.gmra.mxu0 %v3418_v38  ;;  %v3433_v19 = vpop.trf.xlu0  ;;  %v3437_v41 = vunpack.i.l.bf16 %v3423_v46  ;;  %v4603_v38 = vmov 1  }
 0x145   : > { %v3448_v60 = vunpack.i.l.bf16 %v3433_v19 }
 0x146   : > { %691 = vmatpush.msra.mxu1 %v609_v43  ;;  %2408 = vmatpush.msra.mxu3 %v609_v43  ;;  %4602 = vst [vmem:[#allocation42_spill] sm:$0xff] %v3437_v41 }
 0x147   : > { %4604 = vst [vmem:[#allocation43_spill] sm:$0xff] %v3448_v60 }
 0x14a   : > { %885 = vperm.xlu2 %2621, %v3276_v6   ;;  %881 = vperm.xlu1 %2620, %v3255_v59  }
 0x14b   : > { %v551_v9 = vpop.permute.xlu1 %550 }
 0x14c   : > { %v3431_v15 = vpop.permute.xlu2 %797  ;;  %648 = vmatmul.f32.gmra.mxu0 %v3427_v53  ;;  %v3444_v18 = vpop.trf.xlu0 }
 0x14d   : > { %4601 = vst [vmem:[#allocation41_spill] sm:$0xff] %v3431_v15  ;;  %v3461_v15 = vunpack.i.l.bf16 %v3444_v18 }
 0x14f   : > { %4605 = vst [vmem:[#allocation44_spill] sm:$0xff] %v3461_v15 }
 0x152   : > { %893 = vperm.xlu2 %2621, %v3294_v36   ;;  %889 = vperm.xlu1 %2620, %v3273_v4  }
 0x153   : > { %v561_v43 = vpop.permute.xlu1 %560  ;;  %2619 = vset.pattern.permute.xlu0 %v4603_v38 }
 0x154   : > { %v3442_v3 = vpop.permute.xlu2 %805  ;;  %651 = vmatmul.f32.gmra.mxu0 %v3437_v41  ;;  %v3456_v7 = vpop.trf.xlu0  ;;  %v607_v41 = vmul.f32 %v566_v62, %v3288_v26  ;;  %v606_v12 = vmul.f32 %v561_v43, %v3270_v0  ;;  %v4611_v0 = vld [vmem:[#allocation26_spill] sm:$0xff] }
 0x15a   : > { %789 = vperm.xlu0 %2619, %v3076_v2   ;;  %901 = vperm.xlu2 %2621, %v3312_v11  }
 0x15b   : > { %897 = vperm.xlu1 %2620, %v3291_v31   ;;  %v571_v53 = vpop.permute.xlu1 %570 }
 0x15c   : > { %v3453_v54 = vpop.permute.xlu2 %813  ;;  %v608_v38 = vmul.f32 %v571_v53, %v3306_v56  ;;  %654 = vmatmul.f32.gmra.mxu0 %v3448_v60  ;;  %v4607_v53 = vld [vmem:[#allocation37_spill] sm:$0xff]  ;;  %v3475_v43 = vpop.trf.xlu0 }
 0x15d   : > { %v4608_v60 = vld [vmem:[#allocation29_spill] sm:$0xff] }
 0x15e   : > { %692 = vmatpush.msra.mxu1 %v608_v38  ;;  %2409 = vmatpush.msra.mxu3 %v608_v38  ;;  %v605_v38 = vmul.f32 %v3395_v8, %v4608_v60  ;;  %v2805_v8 = vmov 2   ;;  %v4612_v60 = vld [vmem:[#allocation25_spill] sm:$0xff] }
 0x160   : > { %693 = vmatpush.msra.mxu1 %v607_v41  ;;  %2410 = vmatpush.msra.mxu3 %v607_v41  ;;  %v4610_v41 = vld [vmem:[#allocation27_spill] sm:$0xff] }
 0x161   : > { %v604_v26 = vmul.f32 %v551_v9, %v4610_v41 }
 0x162   : > { %905 = vperm.xlu0 %2619, %v3309_v61   ;;  %913 = vperm.xlu2 %2621, %v4606_v17  }
 0x163   : > { %909 = vperm.xlu1 %2620, %v4607_v53   ;;  %694 = vmatpush.msra.mxu1 %v606_v12 }
 0x164   : > { %2411 = vmatpush.msra.mxu3 %v606_v12  ;;  %v3469_v56 = vpop.permute.xlu2 %821  ;;  %v3471_v62 = vpop.permute.xlu1 %793  ;;  %657 = vmatmul.f32.gmra.mxu0 %v3461_v15  ;;  %v603_v12 = vmul.f32 %v3380_v48, %v4611_v0  ;;  %v4614_v48 = vld [vmem:[#allocation24_spill] sm:$0xff]  ;;  %v4615_v15 = vld [vmem:[#allocation10_spill] sm:$0xff] }
 0x165   : > { %4609 = vst [vmem:[#allocation36_spill] sm:$0xff] %v3471_v62  ;;  %695 = vmatpush.msra.mxu1 %v605_v38  ;;  %v602_v62 = vmul.f32 %v541_v23, %v4612_v60  ;;  %v2579_v23 = vpop.trf.xlu0 }
 0x166   : > { %2412 = vmatpush.msra.mxu3 %v605_v38  ;;  %v3482_v38 = vunpack.i.l.bf16 %v3456_v7  ;;  %v3494_v0 = vunpack.i.l.bf16 %v2579_v23 }
 0x167   : > { %696 = vmatpush.msra.mxu1 %v604_v26 }
 0x168   : > { %2413 = vmatpush.msra.mxu3 %v604_v26  ;;  %4613 = vst [vmem:[#allocation37_spill] sm:$0xff] %v3482_v38  ;;  %666 = vmatmul.f32.vlgmr.msra.gmra.mxu2 %v3494_v0 }
 0x169   : > { %697 = vmatpush.msra.mxu1 %v603_v12  ;;  %4617 = vst [vmem:[#allocation45_spill] sm:$0xff] %v3494_v0 }
 0x16a   : > { %2414 = vmatpush.msra.mxu3 %v603_v12  ;;  %2622 = vset.pattern.permute.xlu0 %v2805_v8  ;;  %v601_v12 = vmul.f32 %v3368_v35, %v4614_v48  ;;  %v4619_v35 = vld [vmem:[#allocation18_spill] sm:$0xff] }
 0x16b   : > { %2624 = vset.pattern.permute.xlu2 %v2805_v8  ;;  %1128 = vperm.xlu0 %2622, %v3076_v2   ;;  %v598_v48 = vmul.f32 %v3397_v58, %v4619_v35  ;;  %v4624_v58 = vld [vmem:[#allocation12_spill] sm:$0xff] }
 0x16c   : > { %2623 = vset.pattern.permute.xlu1 %v2805_v8  ;;  %698 = vmatpush.msra.mxu1 %v602_v62  ;;  %v3484_v9 = vpop.permute.xlu2 %829  ;;  %v3486_v26 = vpop.permute.xlu1 %801  ;;  %v4616_v8 = vld [vmem:[#allocation22_spill] sm:$0xff]  ;;  %v596_v35 = vmul.f32 %v3382_v33, %v4624_v58  ;;  %v3527_v33 = vunpack.i.h.bf16 %v2579_v23 }
 0x16d   : > { %2415 = vmatpush.msra.mxu3 %v602_v62  ;;  %1136 = vperm.xlu2 %2624, %v3073_v1   ;;  %v600_v60 = vmul.f32 %v3414_v5, %v4616_v8  ;;  %v4618_v62 = vld [vmem:[#allocation20_spill] sm:$0xff]  ;;  %v3504_v5 = vunpack.i.l.bf16 %v3475_v43  ;;  %v2584_v0 = vpop.trf.xlu0 }
 0x16e   : > { %1132 = vperm.xlu1 %2623, %v4615_v15   ;;  %699 = vmatpush.msra.mxu1 %v601_v12  ;;  %v599_v41 = vmul.f32 %v3361_v28, %v4618_v62  ;;  %v4622_v62 = vld [vmem:[#allocation13_spill] sm:$0xff]  ;;  %v3516_v8 = vunpack.i.l.bf16 %v2584_v0  ;;  %v3542_v23 = vunpack.i.h.bf16 %v2584_v0  ;;  %v3557_v0 = vunpack.i.h.bf16 %v3412_v16 }
 0x16f   : > { %2416 = vmatpush.msra.mxu3 %v601_v12  ;;  %660 = vmatmul.f32.gmra.mxu0 %v3482_v38  ;;  %4620 = vst [vmem:[#allocation20_spill] sm:$0xff] %v3504_v5  ;;  %v4621_v38 = vld [vmem:[#allocation15_spill] sm:$0xff]  ;;  %v3572_v16 = vunpack.i.h.bf16 %v3423_v46  ;;  %v3587_v46 = vunpack.i.h.bf16 %v3433_v19 }
 0x170   : > { %700 = vmatpush.msra.mxu1 %v600_v60  ;;  %v597_v28 = vmul.f32 %v3357_v20, %v4621_v38  ;;  %4625 = vst [vmem:[#allocation18_spill] sm:$0xff] %v3516_v8  ;;  %669 = vmatmul.f32.gmra.mxu2 %v3516_v8  ;;  %v3523_v20 = vunpack.i.h.bf16 %v3378_v24  ;;  %v4628_v38 = vld [vmem:[#allocation6_spill] sm:$0xff]  ;;  %v4636_v8 = vld [vmem:[#allocation21_spill] sm:$0xff] }
 0x171   : > { %2417 = vmatpush.msra.mxu3 %v600_v60  ;;  %4629 = vst [vmem:[#allocation13_spill] sm:$0xff] %v3527_v33 }
 0x172   : > { %701 = vmatpush.msra.mxu1 %v599_v41  ;;  %4627 = vst [vmem:[#allocation15_spill] sm:$0xff] %v3523_v20 }
 0x173   : > { %2418 = vmatpush.msra.mxu3 %v599_v41  ;;  %1148 = vperm.xlu0 %2622, %v3111_v14   ;;  %v4623_v41 = vld [vmem:[#allocation9_spill] sm:$0xff]  ;;  %4645 = vst [vmem:[#allocation47_spill] sm:$0xff] %v3587_v46 }
 0x174   : > { %702 = vmatpush.msra.mxu1 %v598_v48  ;;  %v3506_v12 = vpop.permute.xlu2 %837  ;;  %v3508_v60 = vpop.permute.xlu1 %809 }
 0x175   : > { %2419 = vmatpush.msra.mxu3 %v598_v48  ;;  %1144 = vperm.xlu2 %2624, %v4622_v62   ;;  %v4626_v48 = vld [vmem:[#allocation8_spill] sm:$0xff]  ;;  %v2589_v24 = vpop.trf.xlu0 }
 0x176   : > { %1140 = vperm.xlu1 %2623, %v4623_v41   ;;  %703 = vmatpush.msra.mxu1 %v597_v28  ;;  %v595_v15 = vmul.f32 %v3353_v10, %v4626_v48  ;;  %v4630_v10 = vld [vmem:[#allocation16_spill] sm:$0xff]  ;;  %v4631_v48 = vld [vmem:[#allocation17_spill] sm:$0xff]  ;;  %4634 = vst [vmem:[#allocation8_spill] sm:$0xff] %v3542_v23 }
 0x177   : > { %2420 = vmatpush.msra.mxu3 %v597_v28  ;;  %663 = vmatmul.f32.gmra.mxu0 %v3504_v5  ;;  %v594_v28 = vmul.f32 %v3370_v30, %v4628_v38  ;;  %v3540_v30 = vunpack.i.h.bf16 %v3393_v13  ;;  %v4637_v5 = vld [vmem:[#allocation19_spill] sm:$0xff]  ;;  %4639 = vst [vmem:[#allocation17_spill] sm:$0xff] %v3557_v0 }
 0x178   : > { %704 = vmatpush.msra.mxu1 %v596_v35 }
 0x179   : > { %2421 = vmatpush.msra.mxu3 %v596_v35  ;;  %4633 = vst [vmem:[#allocation12_spill] sm:$0xff] %v3540_v30 }
 0x17a   : > { %705 = vmatpush.msra.mxu1 %v595_v15 }
 0x17b   : > { %2422 = vmatpush.msra.mxu3 %v595_v15  ;;  %1160 = vperm.xlu0 %2622, %v3146_v25   ;;  %v3535_v15 = vunpack.i.l.bf16 %v2589_v24 }
 0x17c   : > { %706 = vmatpush.msra.mxu1 %v594_v28  ;;  %v846_v58 = vpop.permute.xlu2 %845  ;;  %v3530_v35 = vpop.permute.xlu1 %817 }
 0x17d   : > { %2423 = vmatpush.msra.mxu3 %v594_v28  ;;  %1156 = vperm.xlu2 %2624, %v4630_v10   ;;  %4632 = vst [vmem:[#allocation9_spill] sm:$0xff] %v3535_v15  ;;  %v930_v19 = vmul.f32 %v846_v58, %v3303_v51 }
 0x17e   : > { %1152 = vperm.xlu1 %2623, %v4631_v48   ;;  %707 = vmatmul.f32.vlgmr.msra.gmra.mxu1 %v3523_v20  ;;  %v2594_v20 = vpop.trf.xlu0 }
 0x17f   : > { %731 = vmatmul.f32.vlgmr.msra.gmra.mxu3 %v3527_v33  ;;  %672 = vmatmul.f32.gmra.mxu2 %v3535_v15  ;;  %v3552_v33 = vunpack.i.l.bf16 %v2594_v20  ;;  %v4641_v15 = vld [vmem:[#allocation23_spill] sm:$0xff] }
 0x180   : > { %4643 = vst [vmem:[#allocation23_spill] sm:$0xff] %v3572_v16 }
 0x181   : > { %4638 = vst [vmem:[#allocation16_spill] sm:$0xff] %v3552_v33 }
 0x183   : > { %1172 = vperm.xlu0 %2622, %v3159_v29   ;;  %v3559_v29 = vunpack.i.h.bf16 %v2589_v24  ;;  %v3574_v24 = vunpack.i.h.bf16 %v2594_v20 }
 0x184   : > { %v3545_v38 = vpop.permute.xlu2 %853  ;;  %v3547_v28 = vpop.permute.xlu1 %825 }
 0x185   : > { %4635 = vst [vmem:[#allocation6_spill] sm:$0xff] %v3545_v38  ;;  %1168 = vperm.xlu2 %2624, %v4636_v8  }
 0x186   : > { %1164 = vperm.xlu1 %2623, %v4637_v5   ;;  %710 = vmatmul.f32.gmra.mxu1 %v3540_v30  ;;  %4640 = vst [vmem:[#allocation21_spill] sm:$0xff] %v3559_v29  ;;  %v2599_v30 = vpop.trf.xlu0 }
 0x187   : > { %734 = vmatmul.f32.gmra.mxu3 %v3542_v23  ;;  %675 = vmatmul.f32.gmra.mxu2 %v3552_v33  ;;  %v3567_v23 = vunpack.i.l.bf16 %v2599_v30  ;;  %4644 = vst [vmem:[#allocation46_spill] sm:$0xff] %v3574_v24 }
 0x189   : > { %4642 = vst [vmem:[#allocation19_spill] sm:$0xff] %v3567_v23 }
 0x18b   : > { %1184 = vperm.xlu0 %2622, %v3194_v40  }
 0x18c   : > { %v3562_v13 = vpop.permute.xlu2 %861  ;;  %v834_v8 = vpop.permute.xlu1 %833 }
 0x18d   : > { %1180 = vperm.xlu2 %2624, %v3175_v34  }
 0x18e   : > { %1176 = vperm.xlu1 %2623, %v4641_v15   ;;  %713 = vmatmul.f32.gmra.mxu1 %v3557_v0  ;;  %v2604_v15 = vpop.trf.xlu0 }
 0x18f   : > { %737 = vmatmul.f32.gmra.mxu3 %v3559_v29  ;;  %678 = vmatmul.f32.gmra.mxu2 %v3567_v23  ;;  %v3582_v29 = vunpack.i.l.bf16 %v2604_v15  ;;  %v4646_v23 = vld [vmem:[#allocation34_spill] sm:$0xff] }
 0x193   : > { %1196 = vperm.xlu0 %2622, %v3207_v44   ;;  %v3589_v44 = vunpack.i.h.bf16 %v2599_v30  ;;  %v3604_v30 = vunpack.i.h.bf16 %v3444_v18 }
 0x194   : > { %v3577_v33 = vpop.permute.xlu2 %869  ;;  %v842_v38 = vpop.permute.xlu1 %841 }
 0x195   : > { %1192 = vperm.xlu2 %2624, %v3210_v45   ;;  %4647 = vst [vmem:[#allocation34_spill] sm:$0xff] %v3604_v30 }
 0x196   : > { %1188 = vperm.xlu1 %2623, %v3191_v39   ;;  %716 = vmatmul.f32.gmra.mxu1 %v3572_v16  ;;  %v2609_v0 = vpop.trf.xlu0 }
 0x197   : > { %740 = vmatmul.f32.gmra.mxu3 %v3574_v24  ;;  %681 = vmatmul.f32.gmra.mxu2 %v3582_v29  ;;  %v3598_v24 = vunpack.i.l.bf16 %v2609_v0 }
 0x19b   : > { %1208 = vperm.xlu0 %2622, %v3242_v55   ;;  %v929_v55 = vmul.f32 %v842_v38, %v3285_v21  ;;  %v927_v21 = vmul.f32 %v834_v8, %v3249_v57  ;;  %v3631_v57 = vunpack.i.h.bf16 %v2609_v0  ;;  %v924_v8 = vmul.f32 %v3469_v56, %v3201_v42 }
 0x19c   : > { %v3592_v20 = vpop.permute.xlu2 %877  ;;  %v850_v45 = vpop.permute.xlu1 %849  ;;  %v922_v42 = vmul.f32 %v3453_v54, %v3169_v32  ;;  %v3651_v56 = vunpack.i.h.bf16 %v3475_v43  ;;  %v4652_v54 = vld [vmem:[#allocation11_spill] sm:$0xff]  ;;  %v4516_v0 = vmov 3  }
 0x19d   : > { %1204 = vperm.xlu2 %2624, %v3223_v49   ;;  %v931_v16 = vmul.f32 %v850_v45, %v4646_v23  ;;  %v3608_v49 = vunpack.i.h.bf16 %v2604_v15  ;;  %4649 = vst [vmem:[#allocation49_spill] sm:$0xff] %v3631_v57 }
 0x19e   : > { %1200 = vperm.xlu1 %2623, %v3226_v50   ;;  %719 = vmatmul.f32.gmra.mxu1 %v3587_v46  ;;  %v928_v50 = vmul.f32 %v3506_v12, %v3267_v63  ;;  %v2614_v18 = vpop.trf.xlu0  ;;  %v926_v63 = vmul.f32 %v3484_v9, %v3233_v52  ;;  %v3626_v12 = vunpack.i.h.bf16 %v3456_v7  ;;  %v923_v7 = vmul.f32 %v3530_v35, %v3185_v37 }
 0x19f   : > { %743 = vmatmul.f32.gmra.mxu3 %v3589_v44  ;;  %965 = vmatpush.msrb.mxu2 %v931_v16  ;;  %4648 = vst [vmem:[#allocation48_spill] sm:$0xff] %v3608_v49  ;;  %v3620_v38 = vunpack.i.l.bf16 %v2614_v18  ;;  %v925_v16 = vmul.f32 %v3547_v28, %v3217_v47  ;;  %v921_v47 = vmul.f32 %v3508_v60, %v3153_v27  ;;  %v3654_v9 = vunpack.i.h.bf16 %v2614_v18  ;;  %v4651_v27 = vld [vmem:[#allocation14_spill] sm:$0xff] }
 0x1a0   : > { %684 = vmatmul.f32.gmra.mxu2 %v3598_v24  ;;  %v920_v37 = vmul.f32 %v3442_v3, %v3137_v22  ;;  %v919_v32 = vmul.f32 %v3486_v26, %v4651_v27  ;;  %v4654_v3 = vld [vmem:[#allocation7_spill] sm:$0xff]  ;;  %v4655_v22 = vld [vmem:[#allocation36_spill] sm:$0xff] }
 0x1a1   : > { %966 = vmatpush.msrb.mxu2 %v930_v19  ;;  %4650 = vst [vmem:[#allocation50_spill] sm:$0xff] %v3654_v9  ;;  %v917_v60 = vmul.f32 %v4655_v22, %v4654_v3  ;;  %v4656_v19 = vld [vmem:[#allocation28_spill] sm:$0xff]  ;;  %v4666_v3 = vld [vmem:[#allocation29_spill] sm:$0xff] }
 0x1a2   : > { %v4662_v27 = vld [vmem:[#allocation32_spill] sm:$0xff] }
 0x1a3   : > { %1244 = vperm.xlu0 %2622, %v3309_v61   ;;  %967 = vmatpush.msrb.mxu2 %v929_v55  ;;  %v4657_v55 = vld [vmem:[#allocation30_spill] sm:$0xff] }
 0x1a4   : > { %v3612_v45 = vpop.permute.xlu2 %885  ;;  %v3614_v58 = vpop.permute.xlu1 %857 }
 0x1a5   : > { %1248 = vperm.xlu2 %2624, %v4607_v53   ;;  %968 = vmatpush.msrb.mxu2 %v928_v50  ;;  %v4658_v50 = vld [vmem:[#allocation35_spill] sm:$0xff] }
 0x1a6   : > { %1252 = vperm.xlu1 %2623, %v4606_v17   ;;  %722 = vmatmul.f32.gmra.mxu1 %v3604_v30 }
 0x1a7   : > { %746 = vmatmul.f32.gmra.mxu3 %v3608_v49  ;;  %969 = vmatpush.msrb.mxu2 %v927_v21  ;;  %v3845_v49 = vld [vmem:[%s2902_s6 + $0x50] sm:$0xff] }
 0x1a8   : > { %687 = vmatmul.f32.gmra.mxu2 %v3620_v38 }
 0x1a9   : > { %970 = vmatpush.msrb.mxu2 %v926_v63 }
 0x1ab   : > { %1232 = vperm.xlu0 %2622, %v3294_v36   ;;  %971 = vmatpush.msrb.mxu2 %v925_v16 }
 0x1ac   : > { %v3636_v15 = vpop.permute.xlu2 %893  ;;  %v3638_v52 = vpop.permute.xlu1 %865 }
 0x1ad   : > { %1236 = vperm.xlu2 %2624, %v3291_v31   ;;  %972 = vmatpush.msrb.mxu2 %v924_v8  ;;  %v4660_v8 = vld [vmem:[#allocation5_spill] sm:$0xff] }
 0x1ae   : > { %1240 = vperm.xlu1 %2623, %v3312_v11   ;;  %725 = vmatmul.f32.gmra.mxu1 %v3626_v12 }
 0x1af   : > { %749 = vmatmul.f32.gmra.mxu3 %v3631_v57  ;;  %973 = vmatpush.msrb.mxu2 %v923_v7 }
 0x1b1   : > { %974 = vmatpush.msrb.mxu2 %v922_v42 }
 0x1b3   : > { %1220 = vperm.xlu0 %2622, %v3255_v59   ;;  %975 = vmatpush.msrb.mxu2 %v921_v47  ;;  %v4653_v59 = vld [vmem:[#allocation41_spill] sm:$0xff]  ;;  %v4661_v47 = vld [vmem:[#allocation38_spill] sm:$0xff] }
 0x1b4   : > { %v902_v35 = vpop.permute.xlu2 %901  ;;  %v3658_v28 = vpop.permute.xlu1 %873  ;;  %v918_v43 = vmul.f32 %v4653_v59, %v4652_v54  ;;  %v4663_v54 = vld [vmem:[#allocation33_spill] sm:$0xff]  ;;  %v4665_v59 = vld [vmem:[#allocation31_spill] sm:$0xff] }
 0x1b5   : > { %1224 = vperm.xlu2 %2624, %v3276_v6   ;;  %976 = vmatpush.msrb.mxu2 %v920_v37 }
 0x1b6   : > { %1228 = vperm.xlu1 %2623, %v3273_v4   ;;  %728 = vmatmul.f32.gmra.mxu1 %v3651_v56 }
 0x1b7   : > { %752 = vmatmul.f32.gmra.mxu3 %v3654_v9  ;;  %977 = vmatpush.msrb.mxu2 %v919_v32  ;;  %v3825_v9 = vld [vmem:[%s2902_s6 + $0x60] sm:$0xff] }
 0x1b8   : > { %4685 = vst [vmem:[#allocation41_spill] sm:$0xff] %v3825_v9 }
 0x1b9   : > { %978 = vmatpush.msrb.mxu2 %v918_v43  ;;  %v944_v43 = vmul.f32 %v902_v35, %v4665_v59 }
 0x1bb   : > { %2625 = vset.pattern.permute.xlu0 %v4516_v0  ;;  %979 = vmatpush.msrb.mxu2 %v917_v60  ;;  %v4667_v60 = vld [vmem:[#allocation27_spill] sm:$0xff] }
 0x1bc   : > { %1467 = vperm.xlu0 %2625, %v3076_v2   ;;  %v914_v6 = vpop.permute.xlu2 %913  ;;  %v882_v26 = vpop.permute.xlu1 %881  ;;  %v4659_v2 = vld [vmem:[#allocation10_spill] sm:$0xff] }
 0x1bd   : > { %1212 = vperm.xlu2 %2624, %v4656_v19   ;;  %v947_v18 = vmul.f32 %v914_v6, %v4658_v50  ;;  %v942_v6 = vmul.f32 %v3636_v15, %v4667_v60  ;;  %v4669_v50 = vld [vmem:[#allocation40_spill] sm:$0xff] }
 0x1be   : > { %1216 = vperm.xlu1 %2623, %v4657_v55  }
 0x1bf   : > { %1030 = vmatpush.msrb.mxu3 %v947_v18  ;;  %v4671_v18 = vld [vmem:[#allocation24_spill] sm:$0xff] }
 0x1c4   : > { %1487 = vperm.xlu0 %2625, %v3111_v14   ;;  %v890_v21 = vpop.permute.xlu1 %889 }
 0x1c5   : > { %2627 = vset.pattern.permute.xlu2 %v4516_v0 }
 0x1c6   : > { %2626 = vset.pattern.permute.xlu1 %v4516_v0  ;;  %1475 = vperm.xlu2 %2627, %v3073_v1  }
 0x1c7   : > { %1471 = vperm.xlu1 %2626, %v4659_v2   ;;  %v3680_v63 = vpop.permute.xlu2 %1136  ;;  %v939_v2 = vmul.f32 %v882_v26, %v4671_v18 }
 0x1cc   : > { %v790_v16 = vpop.permute.xlu0 %789  ;;  %1499 = vperm.xlu0 %2625, %v3146_v25  }
 0x1cd   : > { %v916_v7 = vmul.f32 %v790_v16, %v4660_v8  ;;  %v898_v42 = vpop.permute.xlu1 %897  ;;  %v3733_v8 = vld [vmem:[%s2902_s6 + $0xa0] sm:$0xff] }
 0x1ce   : > { %1483 = vperm.xlu2 %2627, %v4622_v62   ;;  %v943_v22 = vmul.f32 %v898_v42, %v4666_v3  ;;  %v3738_v42 = vld [vmem:[%s2902_s6 + $0x98] sm:$0xff]  ;;  %v4677_v3 = vld [vmem:[#allocation6_spill] sm:$0xff] }
 0x1cf   : > { %1479 = vperm.xlu1 %2626, %v4623_v41   ;;  %v3686_v14 = vpop.permute.xlu2 %1144  ;;  %980 = vmatpush.msrb.mxu2 %v916_v7  ;;  %v4664_v41 = vld [vmem:[#allocation39_spill] sm:$0xff]  ;;  %v643_v7 = vpop.f32.mrf.mxu0 }
 0x1d0   : > { %981 = vmatmul.f32.vlgmr.msrb.gmra.mxu2 %v4661_v47 }
 0x1d4   : > { %v906_v1 = vpop.permute.xlu0 %905  ;;  %1591 = vperm.xlu0 %2625, %v4606_v17  }
 0x1d5   : > { %v910_v37 = vpop.permute.xlu1 %909  ;;  %v945_v32 = vmul.f32 %v906_v1, %v4662_v27  ;;  %v3743_v1 = vld [vmem:[%s2907_s17 + $0x58] sm:$0xff] }
 0x1d6   : > { %v946_v25 = vmul.f32 %v910_v37, %v4663_v54  ;;  %1495 = vperm.xlu2 %2627, %v4630_v10   ;;  %v4668_v10 = vld [vmem:[#allocation26_spill] sm:$0xff]  ;;  %v3747_v37 = vld [vmem:[%s2902_s6 + $0x90] sm:$0xff] }
 0x1d7   : > { %1491 = vperm.xlu1 %2626, %v4631_v48   ;;  %v3694_v62 = vpop.permute.xlu2 %1156  ;;  %v941_v48 = vmul.f32 %v890_v21, %v4668_v10  ;;  %4674 = vst [vmem:[#allocation14_spill] sm:$0xff] %v3747_v37  ;;  %v934_v27 = vmul.f32 %v3747_v37, %v3562_v13  ;;  %v4676_v13 = vld [vmem:[#allocation43_spill] sm:$0xff] }
 0x1d8   : > { %1031 = vmatpush.msrb.mxu3 %v946_v25  ;;  %984 = vmatmul.f32.gmra.mxu2 %v4664_v41 }
 0x1da   : > { %1032 = vmatpush.msrb.mxu3 %v945_v32 }
 0x1dc   : > { %1033 = vmatpush.msrb.mxu3 %v944_v43  ;;  %1519 = vperm.xlu0 %2625, %v3175_v34   ;;  %v4670_v34 = vld [vmem:[#allocation25_spill] sm:$0xff] }
 0x1dd   : > { %v3702_v19 = vpop.permute.xlu0 %1128  ;;  %v940_v15 = vmul.f32 %v3612_v45, %v4670_v34  ;;  %v3723_v45 = vld [vmem:[%s2902_s6 + $0xa8] sm:$0xff]  ;;  %v3769_v43 = vld [vmem:[%s2902_s6 + $0x80] sm:$0xff] }
 0x1de   : > { %1034 = vmatpush.msrb.mxu3 %v943_v22  ;;  %1527 = vperm.xlu2 %2627, %v3191_v39   ;;  %v4672_v39 = vld [vmem:[#allocation22_spill] sm:$0xff]  ;;  %v937_v26 = vmul.f32 %v3723_v45, %v3658_v28  ;;  %v935_v28 = vmul.f32 %v3738_v42, %v3638_v52  ;;  %v932_v22 = vmul.f32 %v3769_v43, %v4677_v3 }
 0x1df   : > { %1503 = vperm.xlu1 %2626, %v4637_v5   ;;  %v3707_v35 = vpop.permute.xlu2 %1168  ;;  %v938_v5 = vmul.f32 %v3592_v20, %v4672_v39  ;;  %v4673_v20 = vld [vmem:[#allocation42_spill] sm:$0xff]  ;;  %v4680_v39 = vld [vmem:[#allocation12_spill] sm:$0xff] }
 0x1e0   : > { %v3709_v55 = vpop.permute.xlu1 %1132  ;;  %1035 = vmatpush.msrb.mxu3 %v942_v6  ;;  %987 = vmatmul.f32.gmra.mxu2 %v4669_v50  ;;  %v3759_v52 = vld [vmem:[%s2902_s6 + $0x88] sm:$0xff]  ;;  %v4518_v6 = vmov 4  }
 0x1e1   : > { %4675 = vst [vmem:[#allocation11_spill] sm:$0xff] %v3759_v52  ;;  %v933_v54 = vmul.f32 %v3759_v52, %v3614_v58  ;;  %v4678_v58 = vld [vmem:[#allocation15_spill] sm:$0xff]  ;;  %v611_v3 = vld [vmem:[%s2909_s18 + $0x8] sm:$0xff] }
 0x1e2   : > { %1036 = vmatpush.msrb.mxu3 %v941_v48  ;;  %v2647_v48 = vld [vmem:[%s2907_s17 + $0x78] sm:$0xff] }
 0x1e4   : > { %1037 = vmatpush.msrb.mxu3 %v940_v15  ;;  %1579 = vperm.xlu0 %2625, %v3312_v11   ;;  %v4679_v15 = vld [vmem:[#allocation44_spill] sm:$0xff] }
 0x1e5   : > { %v3718_v21 = vpop.permute.xlu0 %1148 }
 0x1e6   : > { %1038 = vmatpush.msrb.mxu3 %v939_v2  ;;  %1587 = vperm.xlu2 %2627, %v4607_v53  }
 0x1e7   : > { %1523 = vperm.xlu1 %2626, %v3194_v40   ;;  %v3727_v16 = vpop.permute.xlu2 %1180  ;;  %v936_v40 = vmul.f32 %v3733_v8, %v3577_v33  ;;  %v3754_v33 = vld [vmem:[%s2907_s17 + $0x60] sm:$0xff] }
 0x1e8   : > { %v3729_v11 = vpop.permute.xlu1 %1140  ;;  %1039 = vmatpush.msrb.mxu3 %v938_v5  ;;  %990 = vmatmul.f32.gmra.mxu2 %v4673_v20 }
 0x1ea   : > { %1040 = vmatpush.msrb.mxu3 %v937_v26 }
 0x1ec   : > { %1041 = vmatpush.msrb.mxu3 %v936_v40  ;;  %1511 = vperm.xlu0 %2625, %v3743_v1   ;;  %v2648_v40 = vld [vmem:[%s2907_s17 + $0x70] sm:$0xff] }
 0x1ed   : > { %v3751_v32 = vpop.permute.xlu0 %1160 }
 0x1ee   : > { %1042 = vmatpush.msrb.mxu3 %v935_v28  ;;  %1515 = vperm.xlu2 %2627, %v3754_v33  }
 0x1ef   : > { %1583 = vperm.xlu1 %2626, %v3309_v61   ;;  %v3763_v25 = vpop.permute.xlu2 %1192  ;;  %v646_v61 = vpop.f32.mrf.mxu0 }
 0x1f0   : > { %v3765_v59 = vpop.permute.xlu1 %1152  ;;  %1043 = vmatpush.msrb.mxu3 %v934_v27  ;;  %993 = vmatmul.f32.gmra.mxu2 %v4676_v13 }
 0x1f2   : > { %1044 = vmatpush.msrb.mxu3 %v933_v54  ;;  %v667_v54 = vpop.f32.mrf.mxu2 }
 0x1f4   : > { %1045 = vmatpush.msrb.mxu3 %v932_v22  ;;  %1567 = vperm.xlu0 %2625, %v3273_v4   ;;  %v610_v4 = vld [vmem:[%s2909_s18] sm:$0xff] }
 0x1f5   : > { %1046 = vmatmul.f32.vlgmr.msrb.gmra.mxu3 %v4678_v58  ;;  %v3775_v60 = vpop.permute.xlu0 %1172 }
 0x1f6   : > { %2629 = vset.pattern.permute.xlu2 %v4518_v6 }
 0x1f7   : > { %2628 = vset.pattern.permute.xlu1 %v4518_v6  ;;  %1930 = vperm.xlu2 %2629, %v4606_v17   ;;  %v3780_v10 = vpop.permute.xlu2 %1204  ;;  %v649_v5 = vpop.f32.mrf.mxu0 }
 0x1f8   : > { %1866 = vperm.xlu1 %2628, %v2647_v48   ;;  %v3783_v34 = vpop.permute.xlu1 %1164  ;;  %996 = vmatmul.f32.gmra.mxu2 %v4679_v15  ;;  %v4682_v48 = vld [vmem:[#allocation17_spill] sm:$0xff] }
 0x1fb   : > { %v708_v18 = vpop.f32.mrf.mxu1 }
 0x1fc   : > { %v709_v2 = vadd.f32 %v708_v18, %v643_v7  ;;  %2634 = vset.pattern.permute.xlu0 %v4518_v6  ;;  %v4681_v7 = vld [vmem:[#allocation37_spill] sm:$0xff]  ;;  %v670_v6 = vpop.f32.mrf.mxu2 }
 0x1fd   : > { %1049 = vmatmul.f32.gmra.mxu3 %v4680_v39  ;;  %1926 = vperm.xlu0 %2634, %v4607_v53   ;;  %v1185_v17 = vpop.permute.xlu0 %1184 }
 0x1fe   : > { %v756_v26 = vadd.f32 %v709_v2, %v610_v4 }
 0x1ff   : > { %1862 = vperm.xlu2 %2629, %v2648_v40   ;;  %v3791_v28 = vpop.permute.xlu2 %1248  ;;  %v1269_v40 = vmul.f32 %v1185_v17, %v3303_v51  ;;  %v3816_v51 = vld [vmem:[%s2902_s6 + $0x68] sm:$0xff]  ;;  %v4684_v17 = vld [vmem:[#allocation23_spill] sm:$0xff] }
 0x200   : > { %2630 = vset.pattern.permute.xlu1 %v4516_v0  ;;  %v1177_v27 = vpop.permute.xlu1 %1176  ;;  %772 = vst [vmem:[%s2909_s18] sm:$0xff] %v756_v26  ;;  %999 = vmatmul.f32.gmra.mxu2 %v4681_v7 }
 0x201   : > { %1575 = vperm.xlu1 %2630, %v3291_v31   ;;  %v1267_v57 = vmul.f32 %v3825_v9, %v1177_v27  ;;  %v1265_v9 = vmul.f32 %v3845_v49, %v3707_v35 }
 0x203   : > { %v711_v53 = vpop.f32.mrf.mxu1 }
 0x204   : > { %v712_v22 = vadd.f32 %v711_v53, %v646_v61  ;;  %v3810_v53 = vld [vmem:[%s2907_s17 + $0x50] sm:$0xff] }
 0x205   : > { %1052 = vmatmul.f32.gmra.mxu3 %v4682_v48  ;;  %1914 = vperm.xlu0 %2634, %v3291_v31   ;;  %v3800_v4 = vpop.permute.xlu0 %1196  ;;  %v652_v31 = vpop.f32.mrf.mxu0 }
 0x206   : > { %v757_v18 = vadd.f32 %v712_v22, %v611_v3  ;;  %v4683_v3 = vld [vmem:[#allocation20_spill] sm:$0xff]  ;;  %v612_v22 = vld [vmem:[%s2909_s18 + $0x10] sm:$0xff] }
 0x207   : > { %2631 = vset.pattern.permute.xlu2 %v4516_v0  ;;  %v3803_v2 = vpop.permute.xlu2 %1236 }
 0x208   : > { %v1189_v26 = vpop.permute.xlu1 %1188  ;;  %773 = vst [vmem:[%s2909_s18 + $0x8] sm:$0xff] %v757_v18  ;;  %1571 = vperm.xlu2 %2631, %v3294_v36   ;;  %1002 = vmatmul.f32.gmra.mxu2 %v4683_v3  ;;  %v2651_v18 = vld [vmem:[%s2907_s17 + $0x48] sm:$0xff] }
 0x209   : > { %v1270_v61 = vmul.f32 %v1189_v26, %v4646_v23  ;;  %1507 = vperm.xlu1 %2630, %v3810_v53   ;;  %v1268_v23 = vmul.f32 %v3816_v51, %v3727_v16  ;;  %v4686_v16 = vmov 4  }
 0x20b   : > { %1304 = vmatpush.msrb.mxu0 %v1270_v61  ;;  %v714_v0 = vpop.f32.mrf.mxu1 }
 0x20c   : > { %v715_v36 = vadd.f32 %v714_v0, %v649_v5  ;;  %v618_v5 = vld [vmem:[%s2909_s18 + $0x40] sm:$0xff] }
 0x20d   : > { %1305 = vmatpush.msrb.mxu0 %v1269_v40  ;;  %1055 = vmatmul.f32.gmra.mxu3 %v4684_v17  ;;  %v3822_v26 = vpop.permute.xlu0 %1208  ;;  %v732_v40 = vpop.f32.mrf.mxu3  ;;  %v613_v17 = vld [vmem:[%s2909_s18 + $0x18] sm:$0xff] }
 0x20e   : > { %1842 = vperm.xlu0 %2634, %v2651_v18   ;;  %v758_v61 = vadd.f32 %v715_v36, %v612_v22  ;;  %v3837_v22 = vld [vmem:[%s2902_s6 + $0x58] sm:$0xff]  ;;  %v4688_v36 = vld [vmem:[#allocation45_spill] sm:$0xff]  ;;  %v733_v27 = vadd.f32 %v732_v40, %v667_v54  ;;  %v2654_v18 = vld [vmem:[%s2907_s17 + $0xe8] sm:$0xff]  ;;  %v655_v7 = vpop.f32.mrf.mxu0 }
 0x20f   : > { %1306 = vmatpush.msrb.mxu0 %v1268_v23  ;;  %v3828_v3 = vpop.permute.xlu2 %1224  ;;  %4687 = vst [vmem:[#allocation7_spill] sm:$0xff] %v3837_v22  ;;  %v1266_v23 = vmul.f32 %v3837_v22, %v3775_v60  ;;  %v2658_v40 = vld [vmem:[%s2907_s17 + $0x40] sm:$0xff] }
 0x210   : > { %v3830_v0 = vpop.permute.xlu1 %1200  ;;  %774 = vst [vmem:[%s2909_s18 + $0x10] sm:$0xff] %v758_v61  ;;  %2633 = vset.pattern.permute.xlu2 %v4686_v16  ;;  %1005 = vmatmul.f32.gmra.mxu2 %v4688_v36  ;;  %v2655_v61 = vld [vmem:[%s2907_s17 + $0x68] sm:$0xff]  ;;  %v764_v36 = vadd.f32 %v733_v27, %v618_v5 }
 0x211   : > { %2632 = vset.pattern.permute.xlu1 %v4686_v16  ;;  %1307 = vmatpush.msrb.mxu0 %v1267_v57  ;;  %v3852_v57 = vld [vmem:[%s2902_s6 + $0x48] sm:$0xff] }
 0x212   : > { %1922 = vperm.xlu2 %2633, %v2654_v18   ;;  %1858 = vperm.xlu1 %2632, %v2655_v61   ;;  %v1264_v54 = vmul.f32 %v3852_v57, %v3783_v34  ;;  %v673_v18 = vpop.f32.mrf.mxu2  ;;  %780 = vst [vmem:[%s2909_s18 + $0x40] sm:$0xff] %v764_v36  ;;  %v619_v36 = vld [vmem:[%s2909_s18 + $0x48] sm:$0xff] }
 0x213   : > { %v717_v60 = vpop.f32.mrf.mxu1  ;;  %1308 = vmatpush.msrb.mxu0 %v1266_v23 }
 0x214   : > { %v718_v22 = vadd.f32 %v717_v60, %v652_v31  ;;  %v3859_v31 = vld [vmem:[%s2902_s6 + $0x40] sm:$0xff] }
 0x215   : > { %1058 = vmatmul.f32.gmra.mxu3 %v3587_v46  ;;  %1309 = vmatpush.msrb.mxu0 %v1265_v9  ;;  %v1245_v35 = vpop.permute.xlu0 %1244  ;;  %4689 = vst [vmem:[#allocation36_spill] sm:$0xff] %v3859_v31  ;;  %v1263_v5 = vmul.f32 %v3859_v31, %v3751_v32  ;;  %v3867_v9 = vld [vmem:[%s2902_s6 + $0xf8] sm:$0xff]  ;;  %v4691_v32 = vld [vmem:[#allocation18_spill] sm:$0xff]  ;;  %v3885_v31 = vld [vmem:[%s2902_s6 + $0xf0] sm:$0xff] }
 0x216   : > { %1838 = vperm.xlu0 %2634, %v2658_v40   ;;  %v759_v23 = vadd.f32 %v718_v22, %v613_v17  ;;  %v735_v17 = vpop.f32.mrf.mxu3  ;;  %v3872_v22 = vld [vmem:[%s2902_s6 + $0x38] sm:$0xff]  ;;  %v2662_v40 = vld [vmem:[%s2907_s17 + $0xe0] sm:$0xff] }
 0x217   : > { %1310 = vmatpush.msrb.mxu0 %v1264_v54  ;;  %v3863_v27 = vpop.permute.xlu2 %1212  ;;  %4690 = vst [vmem:[#allocation28_spill] sm:$0xff] %v3872_v22  ;;  %v1262_v60 = vmul.f32 %v3872_v22, %v3694_v62  ;;  %v736_v54 = vadd.f32 %v735_v17, %v670_v6  ;;  %v1285_v62 = vmul.f32 %v3885_v31, %v3791_v28  ;;  %v614_v22 = vld [vmem:[%s2909_s18 + $0x20] sm:$0xff] }
 0x218   : > { %v1253_v34 = vpop.permute.xlu1 %1252  ;;  %775 = vst [vmem:[%s2909_s18 + $0x18] sm:$0xff] %v759_v23  ;;  %1008 = vmatmul.f32.gmra.mxu2 %v4691_v32  ;;  %v3880_v23 = vld [vmem:[%s2902_s6 + $0x30] sm:$0xff] }
 0x219   : > { %v1286_v61 = vmul.f32 %v3867_v9, %v1253_v34  ;;  %1311 = vmatpush.msrb.mxu0 %v1263_v5  ;;  %4692 = vst [vmem:[#allocation30_spill] sm:$0xff] %v3880_v23  ;;  %v1261_v34 = vmul.f32 %v3880_v23, %v3765_v59  ;;  %v765_v6 = vadd.f32 %v736_v54, %v619_v36  ;;  %v3897_v23 = vld [vmem:[%s2902_s6 + $0xe8] sm:$0xff]  ;;  %v2667_v36 = vld [vmem:[%s2907_s17 + $0x38] sm:$0xff] }
 0x21a   : > { %1918 = vperm.xlu2 %2633, %v2662_v40   ;;  %1854 = vperm.xlu1 %2632, %v3754_v33   ;;  %v3892_v33 = vld [vmem:[%s2902_s6 + $0x28] sm:$0xff]  ;;  %v658_v40 = vpop.f32.mrf.mxu0  ;;  %v1284_v28 = vmul.f32 %v3897_v23, %v1245_v35  ;;  %v3909_v35 = vld [vmem:[%s2902_s6 + $0xe0] sm:$0xff] }
 0x21b   : > { %v720_v5 = vpop.f32.mrf.mxu1  ;;  %1312 = vmatpush.msrb.mxu0 %v1262_v60  ;;  %1369 = vmatpush.msrb.mxu1 %v1286_v61  ;;  %v1260_v59 = vmul.f32 %v3892_v33, %v3718_v21  ;;  %781 = vst [vmem:[%s2909_s18 + $0x48] sm:$0xff] %v765_v6  ;;  %v3903_v60 = vld [vmem:[%s2902_s6 + $0x20] sm:$0xff] }
 0x21c   : > { %v721_v17 = vadd.f32 %v720_v5, %v655_v7  ;;  %4693 = vst [vmem:[#allocation35_spill] sm:$0xff] %v3903_v60  ;;  %v1259_v21 = vmul.f32 %v3903_v60, %v3686_v14  ;;  %v676_v5 = vpop.f32.mrf.mxu2 }
 0x21d   : > { %1061 = vmatmul.f32.gmra.mxu3 %v3604_v30  ;;  %1313 = vmatpush.msrb.mxu0 %v1261_v34  ;;  %v1233_v61 = vpop.permute.xlu0 %1232 }
 0x21e   : > { %1370 = vmatpush.msrb.mxu1 %v1285_v62  ;;  %v760_v7 = vadd.f32 %v721_v17, %v614_v22  ;;  %1834 = vperm.xlu0 %2634, %v2667_v36   ;;  %v620_v62 = vld [vmem:[%s2909_s18 + $0x50] sm:$0xff]  ;;  %v738_v6 = vpop.f32.mrf.mxu3  ;;  %v3916_v17 = vld [vmem:[%s2902_s6 + $0x18] sm:$0xff] }
 0x21f   : > { %1314 = vmatpush.msrb.mxu0 %v1260_v59  ;;  %4695 = vst [vmem:[#allocation5_spill] sm:$0xff] %v3916_v17  ;;  %v1258_v14 = vmul.f32 %v3916_v17, %v3729_v11  ;;  %v4696_v59 = vld [vmem:[#allocation9_spill] sm:$0xff]  ;;  %v3924_v36 = vld [vmem:[%s2902_s6 + $0x10] sm:$0xff]  ;;  %v615_v11 = vld [vmem:[%s2909_s18 + $0x28] sm:$0xff] }
 0x220   : > { %1371 = vmatpush.msrb.mxu1 %v1284_v28  ;;  %v1241_v54 = vpop.permute.xlu1 %1240  ;;  %776 = vst [vmem:[%s2909_s18 + $0x20] sm:$0xff] %v760_v7  ;;  %v3912_v22 = vpop.permute.xlu2 %1475  ;;  %1011 = vmatmul.f32.gmra.mxu2 %v4696_v59  ;;  %v739_v28 = vadd.f32 %v738_v6, %v673_v18  ;;  %v4697_v7 = vmov 3  }
 0x221   : > { %v1283_v34 = vmul.f32 %v3909_v35, %v1241_v54  ;;  %4694 = vst [vmem:[#allocation10_spill] sm:$0xff] %v3912_v22  ;;  %1315 = vmatpush.msrb.mxu0 %v1259_v21  ;;  %v1257_v54 = vmul.f32 %v3924_v36, %v3680_v63  ;;  %v3929_v22 = vld [vmem:[%s2907_s17 + $0xc0] sm:$0xff]  ;;  %v3934_v21 = vld [vmem:[%s2902_s6 + $0xd8] sm:$0xff]  ;;  %v3940_v63 = vld [vmem:[%s2902_s6 + $0x8] sm:$0xff] }
 0x222   : > { %1850 = vperm.xlu2 %2633, %v3743_v1   ;;  %2635 = vset.pattern.permute.xlu1 %v4697_v7  ;;  %4698 = vst [vmem:[#allocation32_spill] sm:$0xff] %v3924_v36  ;;  %v766_v18 = vadd.f32 %v739_v28, %v620_v62  ;;  %v1282_v1 = vmul.f32 %v3934_v21, %v3803_v2  ;;  %v3946_v62 = vld [vmem:[%s2902_s6 + $0xd0] sm:$0xff]  ;;  %v661_v60 = vpop.f32.mrf.mxu0 }
 0x223   : > { %1563 = vperm.xlu1 %2635, %v3929_v22   ;;  %v723_v17 = vpop.f32.mrf.mxu1  ;;  %1316 = vmatpush.msrb.mxu0 %v1258_v14  ;;  %v1256_v36 = vmul.f32 %v3940_v63, %v3709_v55  ;;  %v1281_v28 = vmul.f32 %v3946_v62, %v1233_v61 }
 0x224   : > { %v724_v6 = vadd.f32 %v723_v17, %v658_v40  ;;  %1372 = vmatpush.msrb.mxu1 %v1283_v34  ;;  %782 = vst [vmem:[%s2909_s18 + $0x50] sm:$0xff] %v766_v18  ;;  %v2676_v40 = vld [vmem:[%s2907_s17 + $0x30] sm:$0xff]  ;;  %v3951_v34 = vld [vmem:[%s2902_s6] sm:$0xff]  ;;  %v621_v18 = vld [vmem:[%s2909_s18 + $0x58] sm:$0xff] }
 0x225   : > { %1064 = vmatmul.f32.gmra.mxu3 %v3626_v12  ;;  %1317 = vmatpush.msrb.mxu0 %v1257_v54  ;;  %v1221_v14 = vpop.permute.xlu0 %1220  ;;  %4699 = vst [vmem:[#allocation33_spill] sm:$0xff] %v3951_v34  ;;  %v1255_v17 = vmul.f32 %v3951_v34, %v3702_v19  ;;  %v3957_v54 = vld [vmem:[%s2902_s6 + $0xc8] sm:$0xff] }
 0x226   : > { %v761_v2 = vadd.f32 %v724_v6, %v615_v11  ;;  %1373 = vmatpush.msrb.mxu1 %v1282_v1  ;;  %1830 = vperm.xlu0 %2634, %v2676_v40   ;;  %v741_v1 = vpop.f32.mrf.mxu3  ;;  %v4700_v6 = vld [vmem:[#allocation16_spill] sm:$0xff] }
 0x227   : > { %1318 = vmatpush.msrb.mxu0 %v1256_v36  ;;  %v742_v19 = vadd.f32 %v741_v1, %v676_v5  ;;  %v679_v36 = vpop.f32.mrf.mxu2  ;;  %v3972_v40 = vld [vmem:[%s2907_s17 + $0xb8] sm:$0xff] }
 0x228   : > { %v1229_v55 = vpop.permute.xlu1 %1228  ;;  %777 = vst [vmem:[%s2909_s18 + $0x28] sm:$0xff] %v761_v2  ;;  %1374 = vmatpush.msrb.mxu1 %v1281_v28  ;;  %v3960_v11 = vpop.permute.xlu2 %1483  ;;  %1014 = vmatmul.f32.gmra.mxu2 %v4700_v6  ;;  %v3967_v28 = vld [vmem:[%s2902_s6 + $0xc0] sm:$0xff]  ;;  %v3978_v1 = vld [vmem:[%s2902_s6 + $0xb8] sm:$0xff] }
 0x229   : > { %v1280_v61 = vmul.f32 %v3957_v54, %v1229_v55  ;;  %1319 = vmatpush.msrb.mxu0 %v1255_v17  ;;  %4701 = vst [vmem:[#allocation31_spill] sm:$0xff] %v3967_v28  ;;  %v1279_v2 = vmul.f32 %v3967_v28, %v3828_v3  ;;  %v616_v55 = vld [vmem:[%s2909_s18 + $0x30] sm:$0xff]  ;;  %v2682_v28 = vld [vmem:[%s2907_s17 + $0x28] sm:$0xff] }
 0x22a   : > { %1846 = vperm.xlu2 %2633, %v3810_v53   ;;  %1320 = vmatmul.f32.vlgmr.msrb.gmra.mxu0 %v4661_v47  ;;  %v767_v53 = vadd.f32 %v742_v19, %v621_v18  ;;  %4702 = vst [vmem:[#allocation29_spill] sm:$0xff] %v3978_v1  ;;  %v1278_v47 = vmul.f32 %v3978_v1, %v1221_v14  ;;  %v4705_v1 = vld [vmem:[#allocation13_spill] sm:$0xff] }
 0x22b   : > { %1559 = vperm.xlu1 %2635, %v3972_v40   ;;  %v726_v17 = vpop.f32.mrf.mxu1  ;;  %1375 = vmatpush.msrb.mxu1 %v1280_v61 }
 0x22c   : > { %v727_v5 = vadd.f32 %v726_v17, %v661_v60  ;;  %783 = vst [vmem:[%s2909_s18 + $0x58] sm:$0xff] %v767_v53  ;;  %v3987_v60 = vld [vmem:[%s2902_s6 + $0xb0] sm:$0xff]  ;;  %v622_v17 = vld [vmem:[%s2909_s18 + $0x60] sm:$0xff] }
 0x22d   : > { %1067 = vmatmul.f32.gmra.mxu3 %v3651_v56  ;;  %1376 = vmatpush.msrb.mxu1 %v1279_v2  ;;  %4703 = vst [vmem:[#allocation27_spill] sm:$0xff] %v3987_v60  ;;  %v664_v2 = vpop.f32.mrf.mxu0 }
 0x22e   : > { %v762_v3 = vadd.f32 %v727_v5, %v616_v55  ;;  %1826 = vperm.xlu0 %2634, %v2682_v28   ;;  %v3983_v34 = vpop.permute.xlu0 %1467  ;;  %v744_v14 = vpop.f32.mrf.mxu3  ;;  %v4704_v55 = vld [vmem:[#allocation19_spill] sm:$0xff]  ;;  %v617_v28 = vld [vmem:[%s2909_s18 + $0x38] sm:$0xff] }
 0x22f   : > { %1377 = vmatpush.msrb.mxu1 %v1278_v47  ;;  %v745_v53 = vadd.f32 %v744_v14, %v679_v36  ;;  %v3997_v47 = vld [vmem:[%s2907_s17 + $0xb0] sm:$0xff] }
 0x230   : > { %v1217_v61 = vpop.permute.xlu1 %1216  ;;  %778 = vst [vmem:[%s2909_s18 + $0x30] sm:$0xff] %v762_v3  ;;  %v3990_v19 = vpop.permute.xlu2 %1495  ;;  %1017 = vmatmul.f32.gmra.mxu2 %v4704_v55  ;;  %v2685_v14 = vld [vmem:[%s2907_s17 + $0xd0] sm:$0xff] }
 0x231   : > { %v1277_v18 = vmul.f32 %v3987_v60, %v1217_v61  ;;  %v768_v3 = vadd.f32 %v745_v53, %v622_v17  ;;  %v1276_v61 = vmul.f32 %v3723_v45, %v3863_v27  ;;  %v1275_v60 = vmul.f32 %v3733_v8, %v3822_v26  ;;  %v2686_v17 = vld [vmem:[%s2907_s17 + $0x20] sm:$0xff] }
 0x232   : > { %2637 = vset.pattern.permute.xlu2 %v4697_v7  ;;  %1323 = vmatmul.f32.gmra.mxu0 %v4664_v41  ;;  %v682_v7 = vpop.f32.mrf.mxu2  ;;  %v1274_v27 = vmul.f32 %v3738_v42, %v3780_v10  ;;  %v4027_v10 = vld [vmem:[%s2907_s17 + $0xa8] sm:$0xff] }
 0x233   : > { %1555 = vperm.xlu2 %2637, %v3997_v47   ;;  %2636 = vset.pattern.permute.xlu1 %v4686_v16  ;;  %v729_v5 = vpop.f32.mrf.mxu1  ;;  %784 = vst [vmem:[%s2909_s18 + $0x60] sm:$0xff] %v768_v3 }
 0x234   : > { %v730_v36 = vadd.f32 %v729_v5, %v664_v2  ;;  %1378 = vmatpush.msrb.mxu1 %v1277_v18  ;;  %1910 = vperm.xlu1 %2636, %v2685_v14   ;;  %v4018_v5 = vld [vmem:[%s2902_s6 + $0x78] sm:$0xff] }
 0x235   : > { %1070 = vmatmul.f32.gmra.mxu3 %v4705_v1 }
 0x236   : > { %v763_v41 = vadd.f32 %v730_v36, %v617_v28  ;;  %1379 = vmatpush.msrb.mxu1 %v1276_v61  ;;  %1822 = vperm.xlu0 %2634, %v2686_v17   ;;  %v4010_v53 = vpop.permute.xlu0 %1487  ;;  %v623_v28 = vld [vmem:[%s2909_s18 + $0x68] sm:$0xff]  ;;  %v747_v3 = vpop.f32.mrf.mxu3  ;;  %v1273_v61 = vmul.f32 %v3747_v37, %v3830_v0  ;;  %v4706_v17 = vld [vmem:[#allocation8_spill] sm:$0xff]  ;;  %v1271_v0 = vmul.f32 %v3769_v43, %v3763_v25 }
 0x237   : > { %v2689_v36 = vld [vmem:[%s2907_s17 + $0xc8] sm:$0xff] }
 0x238   : > { %779 = vst [vmem:[%s2909_s18 + $0x38] sm:$0xff] %v763_v41  ;;  %1380 = vmatpush.msrb.mxu1 %v1275_v60  ;;  %v1528_v18 = vpop.permute.xlu2 %1527  ;;  %1020 = vmatmul.f32.gmra.mxu2 %v3582_v29  ;;  %v748_v41 = vadd.f32 %v747_v3, %v682_v7  ;;  %v1272_v60 = vmul.f32 %v3759_v52, %v3800_v4  ;;  %v2690_v7 = vld [vmem:[%s2907_s17 + $0x18] sm:$0xff]  ;;  %v4047_v3 = vld [vmem:[%s2907_s17 + $0xa0] sm:$0xff] }
 0x239   : > { %v4015_v2 = vpop.permute.xlu1 %1471  ;;  %v1609_v26 = vmul.f32 %v4018_v5, %v1528_v18 }
 0x23a   : > { %1381 = vmatpush.msrb.mxu1 %v1274_v27  ;;  %1326 = vmatmul.f32.gmra.mxu0 %v4669_v50  ;;  %v769_v14 = vadd.f32 %v748_v41, %v623_v28  ;;  %v685_v18 = vpop.f32.mrf.mxu2  ;;  %v624_v28 = vld [vmem:[%s2909_s18 + $0x70] sm:$0xff]  ;;  %v4707_v41 = vld [vmem:[#allocation21_spill] sm:$0xff] }
 0x23b   : > { %1551 = vperm.xlu2 %2637, %v4027_v10   ;;  %1643 = vmatpush.msra.mxu2 %v1609_v26 }
 0x23c   : > { %1382 = vmatpush.msrb.mxu1 %v1273_v61  ;;  %1906 = vperm.xlu1 %2636, %v2689_v36   ;;  %785 = vst [vmem:[%s2909_s18 + $0x68] sm:$0xff] %v769_v14 }
 0x23d   : > { %1073 = vmatmul.f32.gmra.mxu3 %v4706_v17 }
 0x23e   : > { %1383 = vmatpush.msrb.mxu1 %v1272_v60  ;;  %1818 = vperm.xlu0 %2634, %v2690_v7   ;;  %v4037_v27 = vpop.permute.xlu0 %1499  ;;  %v750_v25 = vpop.f32.mrf.mxu3  ;;  %v2692_v60 = vld [vmem:[%s2907_s17 + $0x90] sm:$0xff] }
 0x23f   : > { %v751_v43 = vadd.f32 %v750_v25, %v685_v18 }
 0x240   : > { %1384 = vmatpush.msrb.mxu1 %v1271_v0  ;;  %v1588_v4 = vpop.permute.xlu2 %1587  ;;  %1023 = vmatmul.f32.gmra.mxu2 %v3598_v24 }
 0x241   : > { %v4040_v26 = vpop.permute.xlu1 %1479  ;;  %1385 = vmatmul.f32.vlgmr.msrb.gmra.mxu1 %v4678_v58  ;;  %v770_v61 = vadd.f32 %v751_v43, %v624_v28  ;;  %v1624_v25 = vmul.f32 %v3885_v31, %v1588_v4  ;;  %v4708_v58 = vld [vmem:[#allocation46_spill] sm:$0xff] }
 0x242   : > { %1329 = vmatmul.f32.gmra.mxu0 %v4673_v20  ;;  %v688_v7 = vpop.f32.mrf.mxu2 }
 0x243   : > { %1547 = vperm.xlu2 %2637, %v4047_v3   ;;  %786 = vst [vmem:[%s2909_s18 + $0x70] sm:$0xff] %v770_v61  ;;  %v2693_v61 = vld [vmem:[%s2907_s17 + $0x98] sm:$0xff] }
 0x244   : > { %1902 = vperm.xlu1 %2636, %v3929_v22   ;;  %v625_v22 = vld [vmem:[%s2909_s18 + $0x78] sm:$0xff] }
 0x245   : > { %1076 = vmatmul.f32.gmra.mxu3 %v4707_v41 }
 0x246   : > { %1878 = vperm.xlu0 %2634, %v2692_v60   ;;  %v1592_v36 = vpop.permute.xlu0 %1591  ;;  %v753_v28 = vpop.f32.mrf.mxu3 }
 0x247   : > { %v1625_v14 = vmul.f32 %v3867_v9, %v1592_v36  ;;  %v754_v43 = vadd.f32 %v753_v28, %v688_v7  ;;  %v2695_v28 = vld [vmem:[%s2902_s6 + $0x70] sm:$0xff] }
 0x248   : > { %v1516_v18 = vpop.permute.xlu2 %1515  ;;  %1026 = vmatmul.f32.gmra.mxu2 %v3620_v38 }
 0x249   : > { %v4055_v0 = vpop.permute.xlu1 %1491  ;;  %1388 = vmatmul.f32.gmra.mxu1 %v4680_v39  ;;  %1708 = vmatpush.msra.mxu3 %v1625_v14  ;;  %v771_v36 = vadd.f32 %v754_v43, %v625_v22  ;;  %v2694_v39 = vld [vmem:[%s2907_s17] sm:$0xff]  ;;  %v4709_v22 = vld [vmem:[#allocation23_spill] sm:$0xff] }
 0x24a   : > { %1332 = vmatmul.f32.gmra.mxu0 %v4676_v13  ;;  %v2697_v13 = vld [vmem:[%s2907_s17 + $0x80] sm:$0xff] }
 0x24b   : > { %1543 = vperm.xlu2 %2637, %v2693_v61   ;;  %1709 = vmatpush.msra.mxu3 %v1624_v25  ;;  %787 = vst [vmem:[%s2909_s18 + $0x78] sm:$0xff] %v771_v36  ;;  %v4710_v36 = vld [vmem:[#allocation37_spill] sm:$0xff] }
 0x24c   : > { %1898 = vperm.xlu1 %2636, %v3972_v40  }
 0x24d   : > { %1079 = vmatmul.f32.gmra.mxu3 %v4708_v58 }
 0x24e   : > { %1806 = vperm.xlu0 %2634, %v2694_v39   ;;  %v1520_v52 = vpop.permute.xlu0 %1519 }
 0x24f   : > { %v1607_v7 = vmul.f32 %v3816_v51, %v1520_v52 }
 0x251   : > { %v4067_v37 = vpop.permute.xlu1 %1503  ;;  %1391 = vmatmul.f32.gmra.mxu1 %v4682_v48  ;;  %v1931_v4 = vpop.permute.xlu2 %1930 }
 0x252   : > { %1335 = vmatmul.f32.gmra.mxu0 %v4679_v15  ;;  %v1964_v14 = vmul.f32 %v3867_v9, %v1931_v4  ;;  %v2696_v9 = vld [vmem:[%s2907_s17 + $0x88] sm:$0xff]  ;;  %v4712_v4 = vld [vmem:[#allocation48_spill] sm:$0xff] }
 0x253   : > { %1539 = vperm.xlu2 %2637, %v2692_v60   ;;  %v4078_v48 = vpop.f32.mrf.mxu2  ;;  %v4714_v15 = vld [vmem:[#allocation20_spill] sm:$0xff] }
 0x254   : > { %1894 = vperm.xlu1 %2636, %v3997_v47   ;;  %2047 = vmatpush.msra.mxu1 %v1964_v14  ;;  %v4711_v47 = vld [vmem:[#allocation41_spill] sm:$0xff]  ;;  %v4713_v14 = vld [vmem:[#allocation7_spill] sm:$0xff] }
 0x255   : > { %1082 = vmatmul.f32.gmra.mxu3 %v3589_v44  ;;  %v1606_v60 = vmul.f32 %v4711_v47, %v1516_v18 }
 0x256   : > { %v1580_v39 = vpop.permute.xlu0 %1579 }
 0x259   : > { %v1524_v40 = vpop.permute.xlu1 %1523  ;;  %1394 = vmatmul.f32.gmra.mxu1 %v4709_v22  ;;  %v1863_v43 = vpop.permute.xlu2 %1862 }
 0x25a   : > { %v1608_v25 = vmul.f32 %v2695_v28, %v1524_v40  ;;  %1338 = vmatmul.f32.gmra.mxu0 %v4710_v36 }
 0x25b   : > { %1535 = vperm.xlu2 %2637, %v2696_v9   ;;  %v985_v18 = vpop.f32.mrf.mxu2 }
 0x25c   : > { %1644 = vmatpush.msra.mxu2 %v1608_v25  ;;  %1890 = vperm.xlu1 %2636, %v4027_v10   ;;  %v1622_v10 = vmul.f32 %v3909_v35, %v1580_v39 }
 0x25d   : > { %1085 = vmatmul.f32.gmra.mxu3 %v4712_v4 }
 0x25e   : > { %1645 = vmatpush.msra.mxu2 %v1607_v7  ;;  %v1512_v52 = vpop.permute.xlu0 %1511 }
 0x25f   : > { %v1605_v22 = vmul.f32 %v4713_v14, %v1512_v52 }
 0x260   : > { %1646 = vmatpush.msra.mxu2 %v1606_v60  ;;  %v4715_v60 = vld [vmem:[#allocation49_spill] sm:$0xff] }
 0x261   : > { %v1584_v40 = vpop.permute.xlu1 %1583  ;;  %1397 = vmatmul.f32.gmra.mxu1 %v3587_v46  ;;  %v4716_v46 = vld [vmem:[#allocation45_spill] sm:$0xff] }
 0x262   : > { %v1623_v36 = vmul.f32 %v3897_v23, %v1584_v40  ;;  %1647 = vmatpush.msra.mxu2 %v1605_v22  ;;  %1341 = vmatmul.f32.gmra.mxu0 %v4714_v15  ;;  %v1572_v25 = vpop.permute.xlu2 %1571  ;;  %v1947_v22 = vmul.f32 %v2695_v28, %v1863_v43 }
 0x263   : > { %1531 = vperm.xlu2 %2637, %v2697_v13  }
 0x264   : > { %1710 = vmatpush.msra.mxu3 %v1623_v36  ;;  %1886 = vperm.xlu1 %2636, %v4047_v3   ;;  %v2698_v3 = vld [vmem:[%s2907_s17 + $0x10] sm:$0xff]  ;;  %v4717_v36 = vld [vmem:[#allocation50_spill] sm:$0xff] }
 0x265   : > { %1088 = vmatmul.f32.gmra.mxu3 %v4715_v60 }
 0x266   : > { %1711 = vmatpush.msra.mxu3 %v1622_v10  ;;  %v1568_v7 = vpop.permute.xlu0 %1567  ;;  %v4098_v10 = vpop.f32.mrf.mxu2 }
 0x269   : > { %1400 = vmatmul.f32.gmra.mxu1 %v3604_v30 }
 0x26a   : > { %v1867_v52 = vpop.permute.xlu1 %1866  ;;  %1344 = vmatmul.f32.gmra.mxu0 %v4716_v46 }
 0x26b   : > { %v1948_v40 = vmul.f32 %v4018_v5, %v1867_v52  ;;  %2638 = vset.pattern.permute.xlu2 %v4686_v16  ;;  %v2699_v52 = vld [vmem:[%s2907_s17 + $0x8] sm:$0xff] }
 0x26c   : > { %1882 = vperm.xlu1 %2636, %v2693_v61   ;;  %v1923_v39 = vpop.permute.xlu2 %1922  ;;  %1814 = vperm.xlu2 %2638, %v2698_v3   ;;  %v1620_v61 = vmul.f32 %v3946_v62, %v1572_v25 }
 0x26d   : > { %1982 = vmatpush.msra.mxu0 %v1948_v40  ;;  %1091 = vmatmul.f32.gmra.mxu3 %v4717_v36  ;;  %v1962_v28 = vmul.f32 %v3897_v23, %v1923_v39  ;;  %v2261_v23 = vld [vmem:[%s2909_s18 + $0x80] sm:$0xff] }
 0x26f   : > { %1983 = vmatpush.msra.mxu0 %v1947_v22  ;;  %v1927_v30 = vpop.permute.xlu0 %1926 }
 0x270   : > { %v1963_v5 = vmul.f32 %v3885_v31, %v1927_v30  ;;  %v1619_v30 = vmul.f32 %v3957_v54, %v1568_v7 }
 0x271   : > { %1403 = vmatmul.f32.gmra.mxu1 %v3626_v12 }
 0x272   : > { %1347 = vmatmul.f32.gmra.mxu0 %v4691_v32  ;;  %2048 = vmatpush.msra.mxu1 %v1963_v5  ;;  %v991_v5 = vpop.f32.mrf.mxu2 }
 0x273   : > { %v1576_v16 = vpop.permute.xlu1 %1575 }
 0x274   : > { %v1621_v43 = vmul.f32 %v3934_v21, %v1576_v16  ;;  %1810 = vperm.xlu1 %2636, %v2699_v52   ;;  %v1919_v22 = vpop.permute.xlu2 %1918  ;;  %2049 = vmatpush.msra.mxu1 %v1962_v28 }
 0x275   : > { %v1961_v40 = vmul.f32 %v3909_v35, %v1919_v22  ;;  %1874 = vperm.xlu2 %2638, %v2696_v9  }
 0x276   : > { %1712 = vmatpush.msra.mxu3 %v1621_v43  ;;  %v2262_v43 = vld [vmem:[%s2909_s18 + $0x88] sm:$0xff] }
 0x277   : > { %v1915_v31 = vpop.permute.xlu0 %1914  ;;  %2050 = vmatpush.msra.mxu1 %v1961_v40  ;;  %v4719_v40 = vld [vmem:[#allocation28_spill] sm:$0xff] }
 0x278   : > { %1713 = vmatpush.msra.mxu3 %v1620_v61  ;;  %v1047_v39 = vpop.f32.mrf.mxu3  ;;  %v1960_v25 = vmul.f32 %v3934_v21, %v1915_v31  ;;  %v1603_v21 = vmul.f32 %v3852_v57, %v4067_v37  ;;  %v4720_v37 = vld [vmem:[#allocation30_spill] sm:$0xff] }
 0x279   : > { %v1048_v3 = vadd.f32 %v1047_v39, %v4078_v48  ;;  %1406 = vmatmul.f32.gmra.mxu1 %v3651_v56  ;;  %v4718_v48 = vld [vmem:[#allocation36_spill] sm:$0xff]  ;;  %v1600_v31 = vmul.f32 %v4720_v37, %v4055_v0 }
 0x27a   : > { %1714 = vmatpush.msra.mxu3 %v1619_v30  ;;  %1350 = vmatmul.f32.gmra.mxu0 %v4696_v59  ;;  %v1602_v16 = vmul.f32 %v4718_v48, %v4037_v27  ;;  %v1601_v30 = vmul.f32 %v4719_v40, %v3990_v19 }
 0x27b   : > { %v1095_v35 = vadd.f32 %v2261_v23, %v1048_v3  ;;  %v1508_v9 = vpop.permute.xlu1 %1507  ;;  %2051 = vmatpush.msra.mxu1 %v1960_v25  ;;  %v994_v23 = vpop.f32.mrf.mxu2  ;;  %v4721_v25 = vld [vmem:[#allocation35_spill] sm:$0xff] }
 0x27c   : > { %v1604_v7 = vmul.f32 %v3845_v49, %v1508_v9  ;;  %1870 = vperm.xlu1 %2636, %v2697_v13   ;;  %v1851_v28 = vpop.permute.xlu2 %1850  ;;  %v1598_v3 = vmul.f32 %v4721_v25, %v3960_v11  ;;  %v2263_v9 = vld [vmem:[%s2909_s18 + $0x90] sm:$0xff] }
 0x27d   : > { %2277 = vst [vmem:[%s2909_s18 + $0x80] sm:$0xff] %v1095_v35 }
 0x27e   : > { %1648 = vmatpush.msra.mxu2 %v1604_v7 }
 0x280   : > { %v1843_v61 = vpop.permute.xlu0 %1842  ;;  %1649 = vmatpush.msra.mxu2 %v1603_v21  ;;  %v1050_v52 = vpop.f32.mrf.mxu3  ;;  %v4722_v21 = vld [vmem:[#allocation5_spill] sm:$0xff] }
 0x281   : > { %v1051_v22 = vadd.f32 %v1050_v52, %v985_v18  ;;  %1409 = vmatmul.f32.gmra.mxu1 %v4705_v1  ;;  %v1599_v18 = vmul.f32 %v3892_v33, %v4010_v53  ;;  %v4723_v53 = vld [vmem:[#allocation10_spill] sm:$0xff] }
 0x282   : > { %1650 = vmatpush.msra.mxu2 %v1602_v16  ;;  %1353 = vmatmul.f32.gmra.mxu0 %v4700_v6  ;;  %v1597_v16 = vmul.f32 %v4722_v21, %v4040_v26 }
 0x283   : > { %v1096_v13 = vadd.f32 %v2262_v43, %v1051_v22  ;;  %v4724_v43 = vld [vmem:[#allocation32_spill] sm:$0xff]  ;;  %v1595_v22 = vmul.f32 %v3940_v63, %v4015_v2 }
 0x284   : > { %1651 = vmatpush.msra.mxu2 %v1601_v30  ;;  %v1859_v27 = vpop.permute.xlu1 %1858  ;;  %v1847_v39 = vpop.permute.xlu2 %1846  ;;  %v1596_v11 = vmul.f32 %v4724_v43, %v4723_v53  ;;  %v4728_v53 = vld [vmem:[#allocation39_spill] sm:$0xff] }
 0x285   : > { %2278 = vst [vmem:[%s2909_s18 + $0x88] sm:$0xff] %v1096_v13  ;;  %v1946_v19 = vmul.f32 %v3816_v51, %v1859_v27  ;;  %v1944_v13 = vmul.f32 %v4713_v14, %v1851_v28  ;;  %v1943_v2 = vmul.f32 %v3845_v49, %v1847_v39  ;;  %v4726_v28 = vld [vmem:[#allocation38_spill] sm:$0xff]  ;;  %v4727_v49 = vld [vmem:[#allocation31_spill] sm:$0xff] }
 0x286   : > { %1652 = vmatpush.msra.mxu2 %v1600_v31  ;;  %v2264_v31 = vld [vmem:[%s2909_s18 + $0x98] sm:$0xff] }
 0x287   : > { %1984 = vmatpush.msra.mxu0 %v1946_v19 }
 0x288   : > { %v1839_v35 = vpop.permute.xlu0 %1838  ;;  %1653 = vmatpush.msra.mxu2 %v1599_v18  ;;  %v1053_v0 = vpop.f32.mrf.mxu3  ;;  %v4725_v18 = vld [vmem:[#allocation33_spill] sm:$0xff] }
 0x289   : > { %v1054_v7 = vadd.f32 %v1053_v0, %v4098_v10  ;;  %1412 = vmatmul.f32.gmra.mxu1 %v4706_v17  ;;  %v997_v10 = vpop.f32.mrf.mxu2  ;;  %v1594_v19 = vmul.f32 %v4725_v18, %v3983_v34  ;;  %v1942_v0 = vmul.f32 %v3852_v57, %v1843_v61  ;;  %v1941_v14 = vmul.f32 %v4718_v48, %v1839_v35 }
 0x28a   : > { %1654 = vmatpush.msra.mxu2 %v1598_v3  ;;  %1356 = vmatmul.f32.gmra.mxu0 %v4704_v55 }
 0x28b   : > { %v1097_v51 = vadd.f32 %v2263_v9, %v1054_v7  ;;  %v2265_v7 = vld [vmem:[%s2909_s18 + $0xa0] sm:$0xff] }
 0x28c   : > { %1655 = vmatpush.msra.mxu2 %v1597_v16  ;;  %v1855_v52 = vpop.permute.xlu1 %1854 }
 0x28d   : > { %2279 = vst [vmem:[%s2909_s18 + $0x90] sm:$0xff] %v1097_v51  ;;  %v1945_v30 = vmul.f32 %v4711_v47, %v1855_v52  ;;  %v1556_v26 = vpop.permute.xlu2 %1555 }
 0x28e   : > { %1656 = vmatpush.msra.mxu2 %v1596_v11 }
 0x28f   : > { %1985 = vmatpush.msra.mxu0 %v1945_v30 }
 0x290   : > { %1657 = vmatpush.msra.mxu2 %v1595_v22  ;;  %v1056_v27 = vpop.f32.mrf.mxu3  ;;  %v1835_v3 = vpop.permute.xlu0 %1834  ;;  %v4729_v22 = vld [vmem:[#allocation27_spill] sm:$0xff] }
 0x291   : > { %v1057_v9 = vadd.f32 %v1056_v27, %v991_v5  ;;  %1415 = vmatmul.f32.gmra.mxu1 %v4707_v41  ;;  %1986 = vmatpush.msra.mxu0 %v1944_v13  ;;  %v1940_v34 = vmul.f32 %v4719_v40, %v1835_v3  ;;  %v1000_v39 = vpop.f32.mrf.mxu2  ;;  %v1616_v30 = vmul.f32 %v4729_v22, %v1556_v26  ;;  %v4730_v13 = vld [vmem:[#allocation29_spill] sm:$0xff] }
 0x292   : > { %1359 = vmatmul.f32.gmra.mxu0 %v3582_v29  ;;  %1658 = vmatpush.msra.mxu2 %v1594_v19 }
 0x293   : > { %v1098_v47 = vadd.f32 %v2264_v31, %v1057_v9  ;;  %1659 = vmatmul.f32.vlgmr.msra.gmra.mxu2 %v4726_v28  ;;  %1987 = vmatpush.msra.mxu0 %v1943_v2 }
 0x295   : > { %2280 = vst [vmem:[%s2909_s18 + $0x98] sm:$0xff] %v1098_v47  ;;  %v1552_v5 = vpop.permute.xlu2 %1551  ;;  %v1564_v57 = vpop.permute.xlu1 %1563  ;;  %1988 = vmatpush.msra.mxu0 %v1942_v0 }
 0x296   : > { %v1618_v61 = vmul.f32 %v4727_v49, %v1564_v57 }
 0x297   : > { %1989 = vmatpush.msra.mxu0 %v1941_v14 }
 0x298   : > { %v1059_v16 = vpop.f32.mrf.mxu3  ;;  %v1831_v51 = vpop.permute.xlu0 %1830  ;;  %1715 = vmatpush.msra.mxu3 %v1618_v61 }
 0x299   : > { %v1060_v48 = vadd.f32 %v1059_v16, %v994_v23  ;;  %v1939_v35 = vmul.f32 %v4720_v37, %v1831_v51  ;;  %1418 = vmatmul.f32.gmra.mxu1 %v4708_v58  ;;  %1990 = vmatpush.msra.mxu0 %v1940_v34  ;;  %v2266_v23 = vld [vmem:[%s2909_s18 + $0xa8] sm:$0xff]  ;;  %v1615_v37 = vmul.f32 %v3723_v45, %v1552_v5  ;;  %v1003_v9 = vpop.f32.mrf.mxu2  ;;  %v2267_v34 = vld [vmem:[%s2909_s18 + $0xb0] sm:$0xff] }
 0x29a   : > { %1362 = vmatmul.f32.gmra.mxu0 %v3598_v24 }
 0x29b   : > { %v1099_v40 = vadd.f32 %v2265_v7, %v1060_v48  ;;  %1662 = vmatmul.f32.gmra.mxu2 %v4728_v53  ;;  %1991 = vmatpush.msra.mxu0 %v1939_v35 }
 0x29d   : > { %2281 = vst [vmem:[%s2909_s18 + $0xa0] sm:$0xff] %v1099_v40  ;;  %v1548_v11 = vpop.permute.xlu2 %1547  ;;  %v1560_v52 = vpop.permute.xlu1 %1559  ;;  %v2268_v40 = vld [vmem:[%s2909_s18 + $0xb8] sm:$0xff] }
 0x29e   : > { %v1617_v31 = vmul.f32 %v4730_v13, %v1560_v52  ;;  %v1614_v2 = vmul.f32 %v3733_v8, %v1548_v11 }
 0x2a0   : > { %v1062_v27 = vpop.f32.mrf.mxu3  ;;  %v1827_v19 = vpop.permute.xlu0 %1826  ;;  %1716 = vmatpush.msra.mxu3 %v1617_v31 }
 0x2a1   : > { %v1063_v3 = vadd.f32 %v1062_v27, %v997_v10  ;;  %v1938_v0 = vmul.f32 %v3892_v33, %v1827_v19  ;;  %1421 = vmatmul.f32.gmra.mxu1 %v3589_v44  ;;  %v1006_v16 = vpop.f32.mrf.mxu2 }
 0x2a2   : > { %1365 = vmatmul.f32.gmra.mxu0 %v3620_v38  ;;  %1717 = vmatpush.msra.mxu3 %v1616_v30 }
 0x2a3   : > { %v1100_v47 = vadd.f32 %v2266_v23, %v1063_v3  ;;  %1665 = vmatmul.f32.gmra.mxu2 %v4669_v50  ;;  %1992 = vmatpush.msra.mxu0 %v1938_v0  ;;  %v4732_v23 = vld [vmem:[#allocation43_spill] sm:$0xff] }
 0x2a4   : > { %1718 = vmatpush.msra.mxu3 %v1615_v37  ;;  %v4733_v37 = vld [vmem:[#allocation11_spill] sm:$0xff] }
 0x2a5   : > { %2282 = vst [vmem:[%s2909_s18 + $0xa8] sm:$0xff] %v1100_v47  ;;  %v1544_v45 = vpop.permute.xlu2 %1543 }
 0x2a6   : > { %v1613_v10 = vmul.f32 %v3738_v42, %v1544_v45  ;;  %v1911_v26 = vpop.permute.xlu1 %1910  ;;  %1719 = vmatpush.msra.mxu3 %v1614_v2 }
 0x2a7   : > { %v1959_v33 = vmul.f32 %v3946_v62, %v1911_v26  ;;  %v1321_v14 = vpop.f32.mrf.mxu0  ;;  %v4731_v62 = vld [vmem:[#allocation14_spill] sm:$0xff] }
 0x2a8   : > { %v1065_v8 = vpop.f32.mrf.mxu3  ;;  %v1823_v5 = vpop.permute.xlu0 %1822  ;;  %1720 = vmatpush.msra.mxu3 %v1613_v10  ;;  %v4734_v10 = vld [vmem:[#allocation44_spill] sm:$0xff] }
 0x2a9   : > { %v1066_v57 = vadd.f32 %v1065_v8, %v1000_v39  ;;  %v1937_v61 = vmul.f32 %v4721_v25, %v1823_v5  ;;  %1424 = vmatmul.f32.gmra.mxu1 %v4712_v4  ;;  %v1009_v27 = vpop.f32.mrf.mxu2 }
 0x2aa   : > { %2052 = vmatpush.msra.mxu1 %v1959_v33  ;;  %v4195_v33 = vld [vmem:[%s2902_s6 + $0x80] sm:$0xff] }
 0x2ab   : > { %v1101_v7 = vadd.f32 %v2267_v34, %v1066_v57  ;;  %1668 = vmatmul.f32.gmra.mxu2 %v4673_v20  ;;  %1993 = vmatpush.msra.mxu0 %v1937_v61 }
 0x2ad   : > { %2283 = vst [vmem:[%s2909_s18 + $0xb0] sm:$0xff] %v1101_v7  ;;  %v1540_v42 = vpop.permute.xlu2 %1539 }
 0x2ae   : > { %v1612_v51 = vmul.f32 %v4731_v62, %v1540_v42  ;;  %v1907_v48 = vpop.permute.xlu1 %1906  ;;  %v2270_v42 = vld [vmem:[%s2909_s18 + $0xc8] sm:$0xff] }
 0x2af   : > { %v1958_v35 = vmul.f32 %v3957_v54, %v1907_v48  ;;  %v1324_v39 = vpop.f32.mrf.mxu0  ;;  %v4735_v48 = vld [vmem:[#allocation15_spill] sm:$0xff] }
 0x2b0   : > { %v1068_v11 = vpop.f32.mrf.mxu3  ;;  %v1819_v25 = vpop.permute.xlu0 %1818  ;;  %1721 = vmatpush.msra.mxu3 %v1612_v51 }
 0x2b1   : > { %v1069_v52 = vadd.f32 %v1068_v11, %v1003_v9  ;;  %v1936_v30 = vmul.f32 %v4722_v21, %v1819_v25  ;;  %1427 = vmatmul.f32.gmra.mxu1 %v4715_v60  ;;  %v2269_v21 = vld [vmem:[%s2909_s18 + $0xc0] sm:$0xff]  ;;  %v1012_v57 = vpop.f32.mrf.mxu2  ;;  %v2294_v25 = vld [vmem:[%s2909_s18 + $0x108] sm:$0xff] }
 0x2b2   : > { %2053 = vmatpush.msra.mxu1 %v1958_v35  ;;  %v4736_v11 = vld [vmem:[#allocation37_spill] sm:$0xff] }
 0x2b3   : > { %v1102_v31 = vadd.f32 %v2268_v40, %v1069_v52  ;;  %1671 = vmatmul.f32.gmra.mxu2 %v4732_v23  ;;  %1994 = vmatpush.msra.mxu0 %v1936_v30 }
 0x2b5   : > { %2284 = vst [vmem:[%s2909_s18 + $0xb8] sm:$0xff] %v1102_v31  ;;  %v1536_v54 = vpop.permute.xlu2 %1535 }
 0x2b6   : > { %v1611_v19 = vmul.f32 %v4733_v37, %v1536_v54  ;;  %v1903_v3 = vpop.permute.xlu1 %1902  ;;  %v2271_v37 = vld [vmem:[%s2909_s18 + $0xd0] sm:$0xff] }
 0x2b7   : > { %v1957_v9 = vmul.f32 %v4727_v49, %v1903_v3  ;;  %v1327_v0 = vpop.f32.mrf.mxu0  ;;  %v2293_v49 = vld [vmem:[%s2909_s18 + $0x100] sm:$0xff] }
 0x2b8   : > { %1722 = vmatpush.msra.mxu3 %v1611_v19  ;;  %v1071_v2 = vpop.f32.mrf.mxu3 }
 0x2b9   : > { %1430 = vmatmul.f32.gmra.mxu1 %v4717_v36  ;;  %v1072_v47 = vadd.f32 %v1071_v2, %v1006_v16  ;;  %v1015_v3 = vpop.f32.mrf.mxu2 }
 0x2ba   : > { %2054 = vmatpush.msra.mxu1 %v1957_v9 }
 0x2bb   : > { %v1103_v45 = vadd.f32 %v2269_v21, %v1072_v47  ;;  %1674 = vmatmul.f32.gmra.mxu2 %v4734_v10  ;;  %v4737_v21 = vld [vmem:[#allocation12_spill] sm:$0xff] }
 0x2bd   : > { %2285 = vst [vmem:[%s2909_s18 + $0xc0] sm:$0xff] %v1103_v45  ;;  %v1532_v26 = vpop.permute.xlu2 %1531 }
 0x2be   : > { %v1610_v34 = vmul.f32 %v4195_v33, %v1532_v26  ;;  %v1386_v8 = vpop.f32.mrf.mxu1  ;;  %v1899_v5 = vpop.permute.xlu1 %1898  ;;  %v2701_v26 = vld [vmem:[%s2902_s6 + $0xa8] sm:$0xff] }
 0x2bf   : > { %v1387_v61 = vadd.f32 %v1386_v8, %v1321_v14  ;;  %v1956_v7 = vmul.f32 %v4730_v13, %v1899_v5  ;;  %v1330_v16 = vpop.f32.mrf.mxu0 }
 0x2c0   : > { %1723 = vmatpush.msra.mxu3 %v1610_v34  ;;  %v1074_v62 = vpop.f32.mrf.mxu3 }
 0x2c1   : > { %v1434_v51 = vadd.f32 %v2293_v49, %v1387_v61  ;;  %1724 = vmatmul.f32.vlgmr.msra.gmra.mxu3 %v4735_v48  ;;  %2055 = vmatpush.msra.mxu1 %v1956_v7  ;;  %v1075_v35 = vadd.f32 %v1074_v62, %v1009_v27  ;;  %v2272_v49 = vld [vmem:[%s2909_s18 + $0xd8] sm:$0xff]  ;;  %v4738_v61 = vld [vmem:[#allocation17_spill] sm:$0xff] }
 0x2c3   : > { %2309 = vst [vmem:[%s2909_s18 + $0x100] sm:$0xff] %v1434_v51  ;;  %v1104_v40 = vadd.f32 %v2270_v42, %v1075_v35  ;;  %1677 = vmatmul.f32.gmra.mxu2 %v4736_v11  ;;  %v1018_v42 = vpop.f32.mrf.mxu2 }
 0x2c5   : > { %2286 = vst [vmem:[%s2909_s18 + $0xc8] sm:$0xff] %v1104_v40 }
 0x2c6   : > { %v1389_v14 = vpop.f32.mrf.mxu1  ;;  %v1895_v52 = vpop.permute.xlu1 %1894 }
 0x2c7   : > { %v1390_v13 = vadd.f32 %v1389_v14, %v1324_v39  ;;  %v1955_v30 = vmul.f32 %v4729_v22, %v1895_v52  ;;  %v1333_v31 = vpop.f32.mrf.mxu0  ;;  %v1815_v54 = vpop.permute.xlu2 %1814  ;;  %v2295_v22 = vld [vmem:[%s2909_s18 + $0x110] sm:$0xff]  ;;  %v2273_v52 = vld [vmem:[%s2909_s18 + $0xe0] sm:$0xff] }
 0x2c8   : > { %v1077_v19 = vpop.f32.mrf.mxu3  ;;  %v1935_v27 = vmul.f32 %v4724_v43, %v1815_v54  ;;  %v4739_v54 = vld [vmem:[#allocation23_spill] sm:$0xff] }
 0x2c9   : > { %v1435_v9 = vadd.f32 %v2294_v25, %v1390_v13  ;;  %1727 = vmatmul.f32.gmra.mxu3 %v4737_v21  ;;  %2056 = vmatpush.msra.mxu1 %v1955_v30  ;;  %v1078_v2 = vadd.f32 %v1077_v19, %v1012_v57  ;;  %v2702_v25 = vld [vmem:[%s2902_s6 + $0xa0] sm:$0xff]  ;;  %v1879_v19 = vpop.permute.xlu0 %1878 }
 0x2ca   : > { %1995 = vmatpush.msra.mxu0 %v1935_v27 }
 0x2cb   : > { %2310 = vst [vmem:[%s2909_s18 + $0x108] sm:$0xff] %v1435_v9  ;;  %v1105_v39 = vadd.f32 %v2271_v37, %v1078_v2  ;;  %1680 = vmatmul.f32.gmra.mxu2 %v4714_v15  ;;  %v2297_v2 = vld [vmem:[%s2909_s18 + $0x120] sm:$0xff] }
 0x2cd   : > { %2287 = vst [vmem:[%s2909_s18 + $0xd0] sm:$0xff] %v1105_v39 }
 0x2ce   : > { %v1392_v47 = vpop.f32.mrf.mxu1  ;;  %v1891_v45 = vpop.permute.xlu1 %1890 }
 0x2cf   : > { %v1393_v43 = vadd.f32 %v1392_v47, %v1327_v0  ;;  %v1954_v34 = vmul.f32 %v2701_v26, %v1891_v45  ;;  %v1336_v57 = vpop.f32.mrf.mxu0  ;;  %v2296_v0 = vld [vmem:[%s2909_s18 + $0x118] sm:$0xff]  ;;  %v1875_v9 = vpop.permute.xlu2 %1874  ;;  %v2704_v26 = vld [vmem:[%s2902_s6 + $0x90] sm:$0xff] }
 0x2d0   : > { %v1080_v8 = vpop.f32.mrf.mxu3  ;;  %v2703_v45 = vld [vmem:[%s2902_s6 + $0x98] sm:$0xff] }
 0x2d1   : > { %v1436_v5 = vadd.f32 %v2295_v22, %v1393_v43  ;;  %1730 = vmatmul.f32.gmra.mxu3 %v4738_v61  ;;  %2057 = vmatpush.msra.mxu1 %v1954_v34  ;;  %v1081_v7 = vadd.f32 %v1080_v8, %v1015_v3  ;;  %v1951_v34 = vmul.f32 %v2704_v26, %v1879_v19 }
 0x2d3   : > { %2311 = vst [vmem:[%s2909_s18 + $0x110] sm:$0xff] %v1436_v5  ;;  %v1106_v62 = vadd.f32 %v2272_v49, %v1081_v7  ;;  %1683 = vmatmul.f32.gmra.mxu2 %v4716_v46  ;;  %v2274_v49 = vld [vmem:[%s2909_s18 + $0xe8] sm:$0xff]  ;;  %v4740_v7 = vld [vmem:[#allocation47_spill] sm:$0xff] }
 0x2d5   : > { %2288 = vst [vmem:[%s2909_s18 + $0xd8] sm:$0xff] %v1106_v62  ;;  %v2705_v62 = vld [vmem:[%s2902_s6 + $0x88] sm:$0xff]  ;;  %s2726_s6 = scalar_lea.hbm %s4424_s2, 1280 }
 0x2d6   : > { %v1395_v51 = vpop.f32.mrf.mxu1  ;;  %v1887_v35 = vpop.permute.xlu1 %1886  ;;  %p2728_p5 = scmp.lt.s32.totalorder %s2726_s6, %s2722_s3 }
 0x2d7   : > { %v1396_v40 = vadd.f32 %v1395_v51, %v1330_v16  ;;  %v1953_v14 = vmul.f32 %v2702_v25, %v1887_v35  ;;  %v1339_v27 = vpop.f32.mrf.mxu0  ;;  %v1021_v16 = vpop.f32.mrf.mxu2 }
 0x2d8   : > { %v1083_v13 = vpop.f32.mrf.mxu3  ;;  %p2729_p6 = por %p2728_p5, %p2727_p4 }
 0x2d9   : > { %v1437_v30 = vadd.f32 %v2296_v0, %v1396_v40  ;;  %1733 = vmatmul.f32.gmra.mxu3 %v4739_v54  ;;  %2058 = vmatpush.msra.mxu1 %v1953_v14  ;;  %v1084_v37 = vadd.f32 %v1083_v13, %v1018_v42  ;;  %v1950_v0 = vmul.f32 %v2705_v62, %v1875_v9  ;;  %v2298_v40 = vld [vmem:[%s2909_s18 + $0x128] sm:$0xff] }
 0x2da   : > { %p2730_p7 = pnand %p2729_p6, %p2725_p2 }
 0x2db   : > { %2312 = vst [vmem:[%s2909_s18 + $0x118] sm:$0xff] %v1437_v30  ;;  %v1107_v3 = vadd.f32 %v2273_v52, %v1084_v37  ;;  %1686 = vmatmul.f32.gmra.mxu2 %v4691_v32 }
 0x2dd   : > { %2289 = vst [vmem:[%s2909_s18 + $0xe0] sm:$0xff] %v1107_v3  ;;  %v4741_v3 = vld [vmem:[#allocation34_spill] sm:$0xff] }
 0x2de   : > { %v1398_v39 = vpop.f32.mrf.mxu1  ;;  %v1883_v22 = vpop.permute.xlu1 %1882 }
 0x2df   : > { %v1399_v47 = vadd.f32 %v1398_v39, %v1333_v31  ;;  %v1952_v43 = vmul.f32 %v2703_v45, %v1883_v22  ;;  %v1807_v31 = vpop.permute.xlu0 %1806  ;;  %v1342_v35 = vpop.f32.mrf.mxu0 }
 0x2e0   : > { %v1086_v8 = vpop.f32.mrf.mxu3  ;;  %v1024_v52 = vpop.f32.mrf.mxu2  ;;  %v1933_v37 = vmul.f32 %v4725_v18, %v1807_v31 }
 0x2e1   : > { %v1438_v5 = vadd.f32 %v2297_v2, %v1399_v47  ;;  %1736 = vmatmul.f32.gmra.mxu3 %v4740_v7  ;;  %2059 = vmatpush.msra.mxu1 %v1952_v43  ;;  %v1087_v42 = vadd.f32 %v1086_v8, %v1021_v16  ;;  %v2275_v16 = vld [vmem:[%s2909_s18 + $0xf0] sm:$0xff] }
 0x2e3   : > { %2313 = vst [vmem:[%s2909_s18 + $0x120] sm:$0xff] %v1438_v5  ;;  %v1108_v51 = vadd.f32 %v2274_v49, %v1087_v42  ;;  %1689 = vmatmul.f32.gmra.mxu2 %v4696_v59  ;;  %2060 = vmatpush.msra.mxu1 %v1951_v34  ;;  %v2276_v34 = vld [vmem:[%s2909_s18 + $0xf8] sm:$0xff] }
 0x2e5   : > { %2290 = vst [vmem:[%s2909_s18 + $0xe8] sm:$0xff] %v1108_v51  ;;  %2061 = vmatpush.msra.mxu1 %v1950_v0 }
 0x2e6   : > { %v1401_v25 = vpop.f32.mrf.mxu1  ;;  %v1811_v14 = vpop.permute.xlu1 %1810 }
 0x2e7   : > { %v1402_v13 = vadd.f32 %v1401_v25, %v1336_v57  ;;  %v1934_v30 = vmul.f32 %v3940_v63, %v1811_v14  ;;  %v2299_v63 = vld [vmem:[%s2909_s18 + $0x130] sm:$0xff]  ;;  %v1345_v45 = vpop.f32.mrf.mxu0 }
 0x2e8   : > { %v1089_v9 = vpop.f32.mrf.mxu3  ;;  %v1027_v43 = vpop.f32.mrf.mxu2  ;;  %v2303_v25 = vld [vmem:[%s2909_s18 + $0x150] sm:$0xff] }
 0x2e9   : > { %v1439_v19 = vadd.f32 %v2298_v40, %v1402_v13  ;;  %1739 = vmatmul.f32.gmra.mxu3 %v4741_v3  ;;  %1996 = vmatpush.msra.mxu0 %v1934_v30  ;;  %v1090_v2 = vadd.f32 %v1089_v9, %v1024_v52 }
 0x2eb   : > { %2314 = vst [vmem:[%s2909_s18 + $0x128] sm:$0xff] %v1439_v19  ;;  %1692 = vmatmul.f32.gmra.mxu2 %v4700_v6  ;;  %1997 = vmatpush.msra.mxu0 %v1933_v37  ;;  %v1109_v39 = vadd.f32 %v2275_v16, %v1090_v2  ;;  %v2305_v19 = vld [vmem:[%s2909_s18 + $0x160] sm:$0xff] }
 0x2ec   : > { %1998 = vmatmul.f32.vlgmr.msra.gmra.mxu0 %v4726_v28 }
 0x2ed   : > { %2291 = vst [vmem:[%s2909_s18 + $0xf0] sm:$0xff] %v1109_v39  ;;  %v2306_v39 = vld [vmem:[%s2909_s18 + $0x168] sm:$0xff] }
 0x2ee   : > { %v1404_v57 = vpop.f32.mrf.mxu1  ;;  %v1871_v18 = vpop.permute.xlu1 %1870 }
 0x2ef   : > { %v1405_v22 = vadd.f32 %v1404_v57, %v1339_v27  ;;  %v1949_v47 = vmul.f32 %v4195_v33, %v1871_v18  ;;  %v2300_v33 = vld [vmem:[%s2909_s18 + $0x138] sm:$0xff]  ;;  %v1348_v62 = vpop.f32.mrf.mxu0  ;;  %v2307_v18 = vld [vmem:[%s2909_s18 + $0x170] sm:$0xff] }
 0x2f0   : > { %v1092_v49 = vpop.f32.mrf.mxu3 }
 0x2f1   : > { %v1440_v26 = vadd.f32 %v2299_v63, %v1405_v22  ;;  %1742 = vmatmul.f32.gmra.mxu3 %v3626_v12  ;;  %2062 = vmatpush.msra.mxu1 %v1949_v47  ;;  %v1093_v28 = vadd.f32 %v1092_v49, %v1027_v43 }
 0x2f2   : > { %2063 = vmatmul.f32.vlgmr.msra.gmra.mxu1 %v4735_v48  ;;  %v2301_v48 = vld [vmem:[%s2909_s18 + $0x140] sm:$0xff] }
 0x2f3   : > { %2315 = vst [vmem:[%s2909_s18 + $0x130] sm:$0xff] %v1440_v26  ;;  %1695 = vmatmul.f32.gmra.mxu2 %v4704_v55  ;;  %v1110_v27 = vadd.f32 %v2276_v34, %v1093_v28 }
 0x2f4   : > { %2001 = vmatmul.f32.gmra.mxu0 %v4728_v53 }
 0x2f5   : > { %2292 = vst [vmem:[%s2909_s18 + $0xf8] sm:$0xff] %v1110_v27 }
 0x2f6   : > { %v1407_v8 = vpop.f32.mrf.mxu1 }
 0x2f7   : > { %v1408_v5 = vadd.f32 %v1407_v8, %v1342_v35  ;;  %v1351_v31 = vpop.f32.mrf.mxu0 }
 0x2f9   : > { %v1441_v42 = vadd.f32 %v2300_v33, %v1408_v5  ;;  %1745 = vmatmul.f32.gmra.mxu3 %v3651_v56  ;;  %v2326_v33 = vld [vmem:[%s2909_s18 + $0x188] sm:$0xff]  ;;  %v2327_v5 = vld [vmem:[%s2909_s18 + $0x190] sm:$0xff] }
 0x2fa   : > { %2066 = vmatmul.f32.gmra.mxu1 %v4737_v21  ;;  %v2302_v21 = vld [vmem:[%s2909_s18 + $0x148] sm:$0xff] }
 0x2fb   : > { %2316 = vst [vmem:[%s2909_s18 + $0x138] sm:$0xff] %v1441_v42  ;;  %1698 = vmatmul.f32.gmra.mxu2 %v3582_v29 }
 0x2fc   : > { %2004 = vmatmul.f32.gmra.mxu0 %v4669_v50 }
 0x2fe   : > { %v1410_v53 = vpop.f32.mrf.mxu1 }
 0x2ff   : > { %v1411_v0 = vadd.f32 %v1410_v53, %v1345_v45 }
 0x301   : > { %v1442_v51 = vadd.f32 %v2301_v48, %v1411_v0  ;;  %1748 = vmatmul.f32.gmra.mxu3 %v4705_v1 }
 0x302   : > { %2069 = vmatmul.f32.gmra.mxu1 %v4738_v61  ;;  %v1354_v61 = vpop.f32.mrf.mxu0 }
 0x303   : > { %2317 = vst [vmem:[%s2909_s18 + $0x140] sm:$0xff] %v1442_v51  ;;  %1701 = vmatmul.f32.gmra.mxu2 %v3598_v24 }
 0x304   : > { %2007 = vmatmul.f32.gmra.mxu0 %v4673_v20 }
 0x306   : > { %v1413_v35 = vpop.f32.mrf.mxu1 }
 0x307   : > { %v1414_v50 = vadd.f32 %v1413_v35, %v1348_v62  ;;  %v2330_v35 = vld [vmem:[%s2909_s18 + $0x1a8] sm:$0xff] }
 0x309   : > { %v1443_v40 = vadd.f32 %v2302_v21, %v1414_v50  ;;  %1751 = vmatmul.f32.gmra.mxu3 %v4706_v17 }
 0x30a   : > { %2072 = vmatmul.f32.gmra.mxu1 %v4739_v54  ;;  %v2304_v54 = vld [vmem:[%s2909_s18 + $0x158] sm:$0xff]  ;;  %v1357_v37 = vpop.f32.mrf.mxu0 }
 0x30b   : > { %2318 = vst [vmem:[%s2909_s18 + $0x148] sm:$0xff] %v1443_v40  ;;  %1704 = vmatmul.f32.gmra.mxu2 %v3620_v38 }
 0x30c   : > { %2010 = vmatmul.f32.gmra.mxu0 %v4732_v23 }
 0x30e   : > { %v1416_v14 = vpop.f32.mrf.mxu1 }
 0x30f   : > { %v1417_v20 = vadd.f32 %v1416_v14, %v1351_v31 }
 0x311   : > { %v1444_v52 = vadd.f32 %v2303_v25, %v1417_v20  ;;  %1754 = vmatmul.f32.gmra.mxu3 %v4707_v41 }
 0x312   : > { %2075 = vmatmul.f32.gmra.mxu1 %v4740_v7 }
 0x313   : > { %2319 = vst [vmem:[%s2909_s18 + $0x150] sm:$0xff] %v1444_v52  ;;  %v2331_v52 = vld [vmem:[%s2909_s18 + $0x1b0] sm:$0xff] }
 0x314   : > { %2013 = vmatmul.f32.gmra.mxu0 %v4734_v10  ;;  %v1360_v10 = vpop.f32.mrf.mxu0 }
 0x316   : > { %v1419_v13 = vpop.f32.mrf.mxu1  ;;  %v1660_v2 = vpop.f32.mrf.mxu2 }
 0x317   : > { %v1420_v30 = vadd.f32 %v1419_v13, %v1354_v61 }
 0x319   : > { %v1445_v23 = vadd.f32 %v2304_v54, %v1420_v30  ;;  %1757 = vmatmul.f32.gmra.mxu3 %v4708_v58 }
 0x31a   : > { %2078 = vmatmul.f32.gmra.mxu1 %v4741_v3 }
 0x31b   : > { %2320 = vst [vmem:[%s2909_s18 + $0x158] sm:$0xff] %v1445_v23 }
 0x31c   : > { %2016 = vmatmul.f32.gmra.mxu0 %v4736_v11  ;;  %v1363_v57 = vpop.f32.mrf.mxu0 }
 0x31e   : > { %v1422_v7 = vpop.f32.mrf.mxu1 }
 0x31f   : > { %v1423_v16 = vadd.f32 %v1422_v7, %v1357_v37  ;;  %v2358_v37 = vld [vmem:[%s2909_s18 + $0x208] sm:$0xff] }
 0x321   : > { %v1446_v9 = vadd.f32 %v2305_v19, %v1423_v16  ;;  %1760 = vmatmul.f32.gmra.mxu3 %v3589_v44 }
 0x322   : > { %2081 = vmatmul.f32.gmra.mxu1 %v3626_v12 }
 0x323   : > { %2321 = vst [vmem:[%s2909_s18 + $0x160] sm:$0xff] %v1446_v9  ;;  %v2332_v9 = vld [vmem:[%s2909_s18 + $0x1b8] sm:$0xff] }
 0x324   : > { %2019 = vmatmul.f32.gmra.mxu0 %v4714_v15  ;;  %v1663_v15 = vpop.f32.mrf.mxu2  ;;  %v1366_v45 = vpop.f32.mrf.mxu0 }
 0x326   : > { %v1425_v3 = vpop.f32.mrf.mxu1 }
 0x327   : > { %v1426_v63 = vadd.f32 %v1425_v3, %v1360_v10  ;;  %v2359_v3 = vld [vmem:[%s2909_s18 + $0x210] sm:$0xff] }
 0x329   : > { %v1447_v11 = vadd.f32 %v2306_v39, %v1426_v63  ;;  %1763 = vmatmul.f32.gmra.mxu3 %v4712_v4 }
 0x32a   : > { %2084 = vmatmul.f32.gmra.mxu1 %v3651_v56  ;;  %v2308_v56 = vld [vmem:[%s2909_s18 + $0x178] sm:$0xff] }
 0x32b   : > { %2322 = vst [vmem:[%s2909_s18 + $0x168] sm:$0xff] %v1447_v11 }
 0x32c   : > { %2022 = vmatmul.f32.gmra.mxu0 %v4716_v46  ;;  %v1666_v34 = vpop.f32.mrf.mxu2 }
 0x32e   : > { %v1428_v12 = vpop.f32.mrf.mxu1 }
 0x32f   : > { %v1429_v22 = vadd.f32 %v1428_v12, %v1363_v57 }
 0x331   : > { %v1448_v47 = vadd.f32 %v2307_v18, %v1429_v22  ;;  %1766 = vmatmul.f32.gmra.mxu3 %v4715_v60  ;;  %v2333_v22 = vld [vmem:[%s2909_s18 + $0x1c0] sm:$0xff] }
 0x332   : > { %2087 = vmatmul.f32.gmra.mxu1 %v4705_v1 }
 0x333   : > { %2323 = vst [vmem:[%s2909_s18 + $0x170] sm:$0xff] %v1448_v47 }
 0x334   : > { %2025 = vmatmul.f32.gmra.mxu0 %v4691_v32  ;;  %v1669_v1 = vpop.f32.mrf.mxu2  ;;  %v2325_v32 = vld [vmem:[%s2909_s18 + $0x180] sm:$0xff] }
 0x336   : > { %v1431_v43 = vpop.f32.mrf.mxu1 }
 0x337   : > { %v1432_v26 = vadd.f32 %v1431_v43, %v1366_v45 }
 0x339   : > { %v1449_v46 = vadd.f32 %v2308_v56, %v1432_v26  ;;  %1769 = vmatmul.f32.gmra.mxu3 %v4717_v36  ;;  %v2360_v56 = vld [vmem:[%s2909_s18 + $0x218] sm:$0xff] }
 0x33a   : > { %2090 = vmatmul.f32.gmra.mxu1 %v4706_v17 }
 0x33b   : > { %2324 = vst [vmem:[%s2909_s18 + $0x178] sm:$0xff] %v1449_v46 }
 0x33c   : > { %2028 = vmatmul.f32.gmra.mxu0 %v4696_v59  ;;  %v1672_v8 = vpop.f32.mrf.mxu2 }
 0x342   : > { %2093 = vmatmul.f32.gmra.mxu1 %v4707_v41 }
 0x344   : > { %v1725_v49 = vpop.f32.mrf.mxu3  ;;  %2031 = vmatmul.f32.gmra.mxu0 %v4700_v6 }
 0x345   : > { %v1726_v28 = vadd.f32 %v1725_v49, %v1660_v2 }
 0x347   : > { %v1773_v27 = vadd.f32 %v2325_v32, %v1726_v28  ;;  %v2334_v32 = vld [vmem:[%s2909_s18 + $0x1c8] sm:$0xff] }
 0x349   : > { %2341 = vst [vmem:[%s2909_s18 + $0x180] sm:$0xff] %v1773_v27 }
 0x34a   : > { %2096 = vmatmul.f32.gmra.mxu1 %v4708_v58  ;;  %v1675_v58 = vpop.f32.mrf.mxu2 }
 0x34c   : > { %v1728_v17 = vpop.f32.mrf.mxu3  ;;  %2034 = vmatmul.f32.gmra.mxu0 %v4704_v55  ;;  %v2328_v55 = vld [vmem:[%s2909_s18 + $0x198] sm:$0xff] }
 0x34d   : > { %v1729_v59 = vadd.f32 %v1728_v17, %v1663_v15 }
 0x34f   : > { %v1774_v41 = vadd.f32 %v2326_v33, %v1729_v59  ;;  %v2361_v33 = vld [vmem:[%s2909_s18 + $0x220] sm:$0xff] }
 0x351   : > { %2342 = vst [vmem:[%s2909_s18 + $0x188] sm:$0xff] %v1774_v41 }
 0x352   : > { %2099 = vmatmul.f32.gmra.mxu1 %v3589_v44  ;;  %v1678_v44 = vpop.f32.mrf.mxu2 }
 0x354   : > { %v1731_v6 = vpop.f32.mrf.mxu3  ;;  %2037 = vmatmul.f32.gmra.mxu0 %v3582_v29  ;;  %v2329_v29 = vld [vmem:[%s2909_s18 + $0x1a0] sm:$0xff] }
 0x355   : > { %v1732_v42 = vadd.f32 %v1731_v6, %v1666_v34  ;;  %v2335_v6 = vld [vmem:[%s2909_s18 + $0x1d0] sm:$0xff] }
 0x357   : > { %v1775_v62 = vadd.f32 %v2327_v5, %v1732_v42 }
 0x359   : > { %2343 = vst [vmem:[%s2909_s18 + $0x190] sm:$0xff] %v1775_v62 }
 0x35a   : > { %2102 = vmatmul.f32.gmra.mxu1 %v4712_v4 }
 0x35c   : > { %v1734_v48 = vpop.f32.mrf.mxu3  ;;  %2040 = vmatmul.f32.gmra.mxu0 %v3598_v24  ;;  %v1681_v24 = vpop.f32.mrf.mxu2 }
 0x35d   : > { %v1735_v53 = vadd.f32 %v1734_v48, %v1669_v1 }
 0x35f   : > { %v1776_v0 = vadd.f32 %v2328_v55, %v1735_v53  ;;  %v2362_v55 = vld [vmem:[%s2909_s18 + $0x228] sm:$0xff] }
 0x361   : > { %2344 = vst [vmem:[%s2909_s18 + $0x198] sm:$0xff] %v1776_v0 }
 0x362   : > { %2105 = vmatmul.f32.gmra.mxu1 %v4715_v60  ;;  %v2357_v60 = vld [vmem:[%s2909_s18 + $0x200] sm:$0xff] }
 0x364   : > { %v1737_v51 = vpop.f32.mrf.mxu3  ;;  %2043 = vmatmul.f32.gmra.mxu0 %v3620_v38  ;;  %v1684_v13 = vpop.f32.mrf.mxu2 }
 0x365   : > { %v1738_v31 = vadd.f32 %v1737_v51, %v1672_v8 }
 0x367   : > { %v1777_v4 = vadd.f32 %v2329_v29, %v1738_v31  ;;  %v2336_v29 = vld [vmem:[%s2909_s18 + $0x1d8] sm:$0xff] }
 0x369   : > { %2345 = vst [vmem:[%s2909_s18 + $0x1a0] sm:$0xff] %v1777_v4  ;;  %v1999_v21 = vpop.f32.mrf.mxu0 }
 0x36a   : > { %2108 = vmatmul.f32.gmra.mxu1 %v4717_v36 }
 0x36c   : > { %v1740_v50 = vpop.f32.mrf.mxu3  ;;  %v1687_v11 = vpop.f32.mrf.mxu2 }
 0x36d   : > { %v1741_v40 = vadd.f32 %v1740_v50, %v1675_v58 }
 0x36f   : > { %v1778_v61 = vadd.f32 %v2330_v35, %v1741_v40  ;;  %v2064_v25 = vpop.f32.mrf.mxu1 }
 0x370   : > { %v2065_v14 = vadd.f32 %v2064_v25, %v1999_v21 }
 0x371   : > { %2346 = vst [vmem:[%s2909_s18 + $0x1a8] sm:$0xff] %v1778_v61  ;;  %v2002_v38 = vpop.f32.mrf.mxu0 }
 0x372   : > { %v2112_v20 = vadd.f32 %v2357_v60, %v2065_v14  ;;  %v2337_v60 = vld [vmem:[%s2909_s18 + $0x1e0] sm:$0xff] }
 0x374   : > { %2373 = vst [vmem:[%s2909_s18 + $0x200] sm:$0xff] %v2112_v20  ;;  %v1743_v54 = vpop.f32.mrf.mxu3  ;;  %v1690_v34 = vpop.f32.mrf.mxu2  ;;  %v2364_v20 = vld [vmem:[%s2909_s18 + $0x238] sm:$0xff] }
 0x375   : > { %v1744_v36 = vadd.f32 %v1743_v54, %v1678_v44 }
 0x377   : > { %v1779_v30 = vadd.f32 %v2331_v52, %v1744_v36  ;;  %v2067_v23 = vpop.f32.mrf.mxu1 }
 0x378   : > { %v2068_v19 = vadd.f32 %v2067_v23, %v2002_v38 }
 0x379   : > { %2347 = vst [vmem:[%s2909_s18 + $0x1b0] sm:$0xff] %v1779_v30  ;;  %v2005_v7 = vpop.f32.mrf.mxu0 }
 0x37a   : > { %v2113_v16 = vadd.f32 %v2358_v37, %v2068_v19  ;;  %v2338_v37 = vld [vmem:[%s2909_s18 + $0x1e8] sm:$0xff] }
 0x37c   : > { %2374 = vst [vmem:[%s2909_s18 + $0x208] sm:$0xff] %v2113_v16  ;;  %v1746_v10 = vpop.f32.mrf.mxu3  ;;  %v1693_v5 = vpop.f32.mrf.mxu2  ;;  %v2365_v16 = vld [vmem:[%s2909_s18 + $0x240] sm:$0xff] }
 0x37d   : > { %v1747_v2 = vadd.f32 %v1746_v10, %v1681_v24  ;;  %v2363_v24 = vld [vmem:[%s2909_s18 + $0x230] sm:$0xff] }
 0x37f   : > { %v1780_v39 = vadd.f32 %v2332_v9, %v1747_v2  ;;  %v2070_v63 = vpop.f32.mrf.mxu1 }
 0x380   : > { %v2071_v57 = vadd.f32 %v2070_v63, %v2005_v7  ;;  %v2339_v63 = vld [vmem:[%s2909_s18 + $0x1f0] sm:$0xff] }
 0x381   : > { %2348 = vst [vmem:[%s2909_s18 + $0x1b8] sm:$0xff] %v1780_v39  ;;  %v2008_v18 = vpop.f32.mrf.mxu0 }
 0x382   : > { %v2114_v12 = vadd.f32 %v2359_v3, %v2071_v57 }
 0x384   : > { %2375 = vst [vmem:[%s2909_s18 + $0x210] sm:$0xff] %v2114_v12  ;;  %v1749_v15 = vpop.f32.mrf.mxu3  ;;  %v1696_v4 = vpop.f32.mrf.mxu2  ;;  %v2366_v12 = vld [vmem:[%s2909_s18 + $0x248] sm:$0xff] }
 0x385   : > { %v1750_v47 = vadd.f32 %v1749_v15, %v1684_v13 }
 0x387   : > { %v1781_v45 = vadd.f32 %v2333_v22, %v1750_v47  ;;  %v2073_v43 = vpop.f32.mrf.mxu1 }
 0x388   : > { %v2074_v26 = vadd.f32 %v2073_v43, %v2008_v18  ;;  %v2340_v43 = vld [vmem:[%s2909_s18 + $0x1f8] sm:$0xff] }
 0x389   : > { %2349 = vst [vmem:[%s2909_s18 + $0x1c0] sm:$0xff] %v1781_v45  ;;  %v2011_v46 = vpop.f32.mrf.mxu0 }
 0x38a   : > { %v2115_v1 = vadd.f32 %v2360_v56, %v2074_v26 }
 0x38c   : > { %2376 = vst [vmem:[%s2909_s18 + $0x218] sm:$0xff] %v2115_v1  ;;  %v1752_v49 = vpop.f32.mrf.mxu3  ;;  %v1699_v54 = vpop.f32.mrf.mxu2  ;;  %v2367_v1 = vld [vmem:[%s2909_s18 + $0x250] sm:$0xff] }
 0x38d   : > { %v1753_v28 = vadd.f32 %v1752_v49, %v1687_v11 }
 0x38f   : > { %v1782_v27 = vadd.f32 %v2334_v32, %v1753_v28  ;;  %v2076_v17 = vpop.f32.mrf.mxu1 }
 0x390   : > { %v2077_v59 = vadd.f32 %v2076_v17, %v2011_v46 }
 0x391   : > { %2350 = vst [vmem:[%s2909_s18 + $0x1c8] sm:$0xff] %v1782_v27  ;;  %v2014_v8 = vpop.f32.mrf.mxu0 }
 0x392   : > { %v2116_v41 = vadd.f32 %v2361_v33, %v2077_v59  ;;  %v2368_v33 = vld [vmem:[%s2909_s18 + $0x258] sm:$0xff] }
 0x394   : > { %2377 = vst [vmem:[%s2909_s18 + $0x220] sm:$0xff] %v2116_v41  ;;  %v1755_v42 = vpop.f32.mrf.mxu3  ;;  %v1702_v39 = vpop.f32.mrf.mxu2 }
 0x395   : > { %v1756_v62 = vadd.f32 %v1755_v42, %v1690_v34 }
 0x397   : > { %v1783_v58 = vadd.f32 %v2335_v6, %v1756_v62  ;;  %v2079_v48 = vpop.f32.mrf.mxu1 }
 0x398   : > { %v2080_v53 = vadd.f32 %v2079_v48, %v2014_v8 }
 0x399   : > { %2351 = vst [vmem:[%s2909_s18 + $0x1d0] sm:$0xff] %v1783_v58  ;;  %v2017_v0 = vpop.f32.mrf.mxu0 }
 0x39a   : > { %v2117_v44 = vadd.f32 %v2362_v55, %v2080_v53  ;;  %v2370_v55 = vld [vmem:[%s2909_s18 + $0x268] sm:$0xff] }
 0x39c   : > { %2378 = vst [vmem:[%s2909_s18 + $0x228] sm:$0xff] %v2117_v44  ;;  %v1758_v51 = vpop.f32.mrf.mxu3  ;;  %v1705_v56 = vpop.f32.mrf.mxu2 }
 0x39d   : > { %v1759_v31 = vadd.f32 %v1758_v51, %v1693_v5  ;;  %v2369_v5 = vld [vmem:[%s2909_s18 + $0x260] sm:$0xff] }
 0x39f   : > { %v1784_v21 = vadd.f32 %v2336_v29, %v1759_v31  ;;  %v2082_v35 = vpop.f32.mrf.mxu1  ;;  %v2371_v29 = vld [vmem:[%s2909_s18 + $0x270] sm:$0xff] }
 0x3a0   : > { %v2083_v50 = vadd.f32 %v2082_v35, %v2017_v0 }
 0x3a1   : > { %2352 = vst [vmem:[%s2909_s18 + $0x1d8] sm:$0xff] %v1784_v21  ;;  %v2020_v40 = vpop.f32.mrf.mxu0 }
 0x3a2   : > { %v2118_v61 = vadd.f32 %v2363_v24, %v2083_v50  ;;  %v2372_v24 = vld [vmem:[%s2909_s18 + $0x278] sm:$0xff] }
 0x3a4   : > { %2379 = vst [vmem:[%s2909_s18 + $0x230] sm:$0xff] %v2118_v61  ;;  %v1761_v25 = vpop.f32.mrf.mxu3 }
 0x3a5   : > { %v1762_v14 = vadd.f32 %v1761_v25, %v1696_v4 }
 0x3a7   : > { %v1785_v38 = vadd.f32 %v2337_v60, %v1762_v14  ;;  %v2085_v52 = vpop.f32.mrf.mxu1 }
 0x3a8   : > { %v2086_v36 = vadd.f32 %v2085_v52, %v2020_v40 }
 0x3a9   : > { %2353 = vst [vmem:[%s2909_s18 + $0x1e0] sm:$0xff] %v1785_v38  ;;  %v2023_v13 = vpop.f32.mrf.mxu0 }
 0x3aa   : > { %v2119_v30 = vadd.f32 %v2364_v20, %v2086_v36 }
 0x3ac   : > { %2380 = vst [vmem:[%s2909_s18 + $0x238] sm:$0xff] %v2119_v30  ;;  %v1764_v23 = vpop.f32.mrf.mxu3 }
 0x3ad   : > { %v1765_v19 = vadd.f32 %v1764_v23, %v1699_v54 }
 0x3af   : > { %v1786_v7 = vadd.f32 %v2338_v37, %v1765_v19  ;;  %v2088_v9 = vpop.f32.mrf.mxu1 }
 0x3b0   : > { %v2089_v10 = vadd.f32 %v2088_v9, %v2023_v13 }
 0x3b1   : > { %2354 = vst [vmem:[%s2909_s18 + $0x1e8] sm:$0xff] %v1786_v7  ;;  %v2026_v2 = vpop.f32.mrf.mxu0 }
 0x3b2   : > { %v2120_v3 = vadd.f32 %v2365_v16, %v2089_v10 }
 0x3b4   : > { %2381 = vst [vmem:[%s2909_s18 + $0x240] sm:$0xff] %v2120_v3  ;;  %v1767_v11 = vpop.f32.mrf.mxu3 }
 0x3b5   : > { %v1768_v57 = vadd.f32 %v1767_v11, %v1702_v39 }
 0x3b7   : > { %v1787_v18 = vadd.f32 %v2339_v63, %v1768_v57  ;;  %v2091_v22 = vpop.f32.mrf.mxu1 }
 0x3b8   : > { %v2092_v15 = vadd.f32 %v2091_v22, %v2026_v2 }
 0x3b9   : > { %2355 = vst [vmem:[%s2909_s18 + $0x1f0] sm:$0xff] %v1787_v18  ;;  %v2029_v47 = vpop.f32.mrf.mxu0 }
 0x3ba   : > { %v2121_v45 = vadd.f32 %v2366_v12, %v2092_v15 }
 0x3bc   : > { %2382 = vst [vmem:[%s2909_s18 + $0x248] sm:$0xff] %v2121_v45  ;;  %v1770_v26 = vpop.f32.mrf.mxu3 }
 0x3bd   : > { %v1771_v46 = vadd.f32 %v1770_v26, %v1705_v56 }
 0x3bf   : > { %v1788_v34 = vadd.f32 %v2340_v43, %v1771_v46  ;;  %v2094_v32 = vpop.f32.mrf.mxu1 }
 0x3c0   : > { %v2095_v49 = vadd.f32 %v2094_v32, %v2029_v47 }
 0x3c1   : > { %2356 = vst [vmem:[%s2909_s18 + $0x1f8] sm:$0xff] %v1788_v34  ;;  %v2032_v28 = vpop.f32.mrf.mxu0 }
 0x3c2   : > { %v2122_v27 = vadd.f32 %v2367_v1, %v2095_v49 }
 0x3c4   : > { %2383 = vst [vmem:[%s2909_s18 + $0x250] sm:$0xff] %v2122_v27 }
 0x3c7   : > { %v2097_v17 = vpop.f32.mrf.mxu1 }
 0x3c8   : > { %v2098_v59 = vadd.f32 %v2097_v17, %v2032_v28 }
 0x3c9   : > { %v2035_v8 = vpop.f32.mrf.mxu0 }
 0x3ca   : > { %v2123_v41 = vadd.f32 %v2368_v33, %v2098_v59 }
 0x3cc   : > { %2384 = vst [vmem:[%s2909_s18 + $0x258] sm:$0xff] %v2123_v41 }
 0x3cf   : > { %v2100_v6 = vpop.f32.mrf.mxu1 }
 0x3d0   : > { %v2101_v42 = vadd.f32 %v2100_v6, %v2035_v8 }
 0x3d1   : > { %v2038_v58 = vpop.f32.mrf.mxu0 }
 0x3d2   : > { %v2124_v62 = vadd.f32 %v2369_v5, %v2101_v42 }
 0x3d4   : > { %2385 = vst [vmem:[%s2909_s18 + $0x260] sm:$0xff] %v2124_v62 }
 0x3d7   : > { %v2103_v48 = vpop.f32.mrf.mxu1 }
 0x3d8   : > { %v2104_v53 = vadd.f32 %v2103_v48, %v2038_v58 }
 0x3d9   : > { %v2041_v44 = vpop.f32.mrf.mxu0 }
 0x3da   : > { %v2125_v0 = vadd.f32 %v2370_v55, %v2104_v53 }
 0x3dc   : > { %2386 = vst [vmem:[%s2909_s18 + $0x268] sm:$0xff] %v2125_v0 }
 0x3df   : > { %v2106_v51 = vpop.f32.mrf.mxu1 }
 0x3e0   : > { %v2107_v31 = vadd.f32 %v2106_v51, %v2041_v44 }
 0x3e1   : > { %v2044_v21 = vpop.f32.mrf.mxu0 }
 0x3e2   : > { %v2126_v4 = vadd.f32 %v2371_v29, %v2107_v31 }
 0x3e4   : > { %2387 = vst [vmem:[%s2909_s18 + $0x270] sm:$0xff] %v2126_v4 }
 0x3e7   : > { %v2109_v35 = vpop.f32.mrf.mxu1 }
 0x3e8   : > { %v2110_v50 = vadd.f32 %v2109_v35, %v2044_v21 }
 0x3ea   : > { %v2127_v40 = vadd.f32 %v2372_v24, %v2110_v50 }
 0x3ec   : > { %2388 = vst [vmem:[%s2909_s18 + $0x278] sm:$0xff] %v2127_v40 }
 0x3ed   : > { %2733 = shalt.err (!%p2730_p7)
}
 0x3ee   : > { %s2808_s26 = smov 128   ;;  %s2809_s17 = smov 8  }
 0x3ef   : > { %2426 = dma.vmem_to_hbm [thread:$0]  (%p2874_p3), %s2158_s28, 10240, %s2160_s29, %s2145_s13, %s2808_s26, %s2808_s26, %s2809_s17  }
 0x3f0 PF: > { %p2432_p8 = scmp.ge.s32.totalorder %s2800_s16, 2  ;;  %s2174_s18 = sand.u32 1, %s2772_s9  }
 0x3f1   : > { %s2175_s12 = scalar_lea.sflag [#allocation3], %s2174_s18 }
 0x3f2   : > { %p2429_p10 = pnand %p2432_p8, %p2884_p9 }
 0x3f4   : > { %p2430_p11 = pneg %p2429_p10 }
 0x3f6   : > { %2767 = dma.done.wait (%p2430_p11), %s2175_s12, 10240  }
 0x3f7   : > { %2769 = vsyncadd (%p2430_p11), %s2175_s12, 4294957056  ;;  %s15_s16 = sadd.s32 1, %s2800_s16   ;;  %s4742_s9 = smov %s2776_s10 }
 0x3f8   : > { %p12_p12 = scmp.ge.s32.totalorder %s15_s16, 6   ;;  %s4743_s10 = smov %s2780_s11 }
 0x3f9   : > { %s4744_s11 = smov %s2892_s25  ;;  %s4745_s12 = smov %s2792_s14 }
 0x3fa   : > { %s4746_s13 = smov %s2796_s15  ;;  %s4747_s14 = smov %s4750_s19 }
 0x3fb   : > { %s4748_s15 = smov %s4754_s20  ;;  %14 = sbr.rel (!%p12_p12) target bundleno = 5 (0x5), region = 74 }
 0x400   :  { %2181 = vsyncpa [#allocation3], 1 }
 0x401   :  { %2183 = vsyncpa [#allocation3 + $0x1], 1 }

</bundles_post_ra>
